<compile_context>
chip_gen: v6e
topology: v6e:2x2x1
jax: 0.10.0
libtpu: 0.0.40
codegen_flags: <defaults>
</compile_context>

<pallas_src>
import jax
import jax.numpy as jnp
from jax.experimental import pallas as pl
from jax.experimental.pallas import tpu as pltpu


# ------------------------------- Pallas kernel -------------------------------
def adfusion_kernel(f0_ref, f1_ref, w_ref, b_ref, wh_ref, wwt_ref, out_ref,
                    zc_ref):
    """One (batch, output-row-tile) grid step.

    f0_ref : (1, C2, TH, W0) f32  VMEM  high-res feature tile (NCHW)
    f1_ref : (1, C1, H1, W1) f32  VMEM  low-res feature, whole image (NCHW)
    w_ref  : (C2, C1)        f32  SMEM  1x1 conv weight with BN folded in
    b_ref  : (C2,)           f32  SMEM  1x1 conv bias   with BN folded in
    wh_ref : (TH, H1)        f32  VMEM  row-tile slice of H interpolation matrix
    wwt_ref: (W1, W0)        bf16 VMEM  transposed W interpolation matrix
    out_ref: (1, C2, TH, W0) f32  VMEM
    zc_ref : (H1, C2*W0)     bf16 VMEM scratch; persists across the t axis
    """
    C2 = f0_ref.shape[1]
    C1 = f1_ref.shape[1]
    W0 = f0_ref.shape[3]
    H1 = f1_ref.shape[2]

    # --- once per batch image (tile-invariant): conv1x1+BN+ReLU, W-upsample --
    @pl.when(pl.program_id(1) == 0)
    def _():
        f1p = [f1_ref[0, k] for k in range(C1)]          # each (H1, W1) f32
        ys = []
        for c in range(C2):
            # Channel counts are tiny -> broadcast multiply-adds on the VPU
            # with scalar weights from SMEM.  (For large C1/C2 this should be
            # one MXU matmul with channels padded to the MXU tile.)
            acc = w_ref[c, 0] * f1p[0]
            for k in range(1, C1):
                acc = acc + w_ref[c, k] * f1p[k]
            ys.append(jnp.maximum(acc + b_ref[c], 0.0))  # (H1, W1) f32
        # One batched MXU matmul for the width upsample of all channels.
        ystack = jnp.concatenate(ys, axis=0).astype(jnp.bfloat16)  # (C2*H1, W1)
        z = jnp.dot(ystack, wwt_ref[...],
                    preferred_element_type=jnp.float32)            # (C2*H1, W0)
        zb = z.astype(jnp.bfloat16)
        for c in range(C2):
            zc_ref[:, c * W0:(c + 1) * W0] = zb[c * H1:(c + 1) * H1, :]

    # --- per-tile hot path: ONE batched H-upsample matmul ---------------------
    wh = wh_ref[...].astype(jnp.bfloat16)                          # (TH, H1)
    u = jnp.dot(wh, zc_ref[...],
                preferred_element_type=jnp.float32)                # (TH, C2*W0)

    # Park the upsampled planes in out_ref (instead of keeping them live)
    # and re-read them below -> lower peak VMEM temps.
    for c in range(C2):
        out_ref[0, c] = u[:, c * W0:(c + 1) * W0].astype(out_ref.dtype)

    # --- channel-wise max (plain VPU maxes), sigmoid gate ---------------------
    m0 = f0_ref[0, 0]
    m1 = out_ref[0, 0]
    for c in range(1, C2):
        m0 = jnp.maximum(m0, f0_ref[0, c])
        m1 = jnp.maximum(m1, out_ref[0, c])
    gate = jax.nn.sigmoid(m0 + m1)                                 # (TH, W0)

    # --- fused elementwise output: a*b + a + b with a=f0*g, b=f1_up*g ---------
    for c in range(C2):
        a = f0_ref[0, c] * gate
        b = out_ref[0, c] * gate
        out_ref[0, c] = (a * b + a + b).astype(out_ref.dtype)


# ------------------------------ glue / wrapper --------------------------------
def _vmem_capacity_bytes():
    """Per-core VMEM capacity; fall back to the most restrictive listed chip."""
    try:
        return int(pltpu.get_tpu_info().vmem_capacity_bytes)
    except Exception:  # pragma: no cover - older jax / no TPU at trace time
        return 64 * 2 ** 20  # v7x per-TensorCore VMEM


def _vmem_bytes_needed(tile_h, W0, H1, W1, C1, C2):
    f0_blk = 4 * C2 * tile_h * W0            # f32 f0 tile
    out_blk = f0_blk                         # f32 out tile
    f1_blk = 4 * C1 * H1 * W1                # f32 low-res image
    wh_blk = 4 * tile_h * H1                 # f32 Wh row tile
    wwt_blk = 2 * W1 * W0                    # bf16 Ww^T
    zcache = 2 * H1 * C2 * W0                # bf16 z-cache scratch
    pipelined = 2 * (f0_blk + out_blk + f1_blk + wh_blk + wwt_blk)  # dbl-buffer
    temps = 4 * tile_h * C2 * W0 + 8 * 4 * tile_h * W0  # u + gate/epilogue tmp
    return pipelined + zcache + temps


def _pick_tile_h(H0, W0, H1, W1, C1, C2, vmem_cap):
    """Biggest row tile (multiple of 8 dividing H0, or H0) within ~75% VMEM."""
    cands = sorted({h for h in range(8, H0 + 1, 8) if H0 % h == 0} | {H0},
                   reverse=True)
    budget = int(0.75 * vmem_cap)
    for th in cands:
        if _vmem_bytes_needed(th, W0, H1, W1, C1, C2) <= budget:
            return th
    return cands[-1]


def _interp_matrix(n_out, n_in):
    """Row-stochastic bilinear (align_corners=True) interpolation matrix."""
    if n_out == 1 or n_in == 1:
        return jnp.zeros((n_out, n_in), jnp.float32).at[:, 0].set(1.0)
    dst = jnp.arange(n_out, dtype=jnp.float32)
    src = dst * (n_in - 1) / (n_out - 1)
    lo = jnp.clip(jnp.floor(src).astype(jnp.int32), 0, n_in - 2)
    frac = src - lo.astype(jnp.float32)
    rows = jnp.arange(n_out)
    w = jnp.zeros((n_out, n_in), jnp.float32)
    w = w.at[rows, lo].add(1.0 - frac)
    w = w.at[rows, lo + 1].add(frac)
    return w


def adfusion_pallas(f0, f1, eff_w, eff_b, wh, ww, *, tile_h=None):
    """f0: (B, C2, H0, W0)  f1: (B, C1, H1, W1)  (NCHW, like PyTorch).

    eff_w: (C2, C1), eff_b: (C2,) -- 1x1 conv with inference-mode BN folded in.
    wh: (H0, H1), ww: (W0, W1)    -- separable bilinear (align_corners=True).
    """
    B, C2, H0, W0 = f0.shape
    _, C1, H1, W1 = f1.shape
    assert H0 % H1 == 0 and W0 == W1 * (H0 // H1), "integer upsample factor expected"

    vmem_cap = _vmem_capacity_bytes()
    if tile_h is None:
        tile_h = _pick_tile_h(H0, W0, H1, W1, C1, C2, vmem_cap)
    assert H0 % tile_h == 0 and (tile_h % 8 == 0 or tile_h == H0)
    n_t = H0 // tile_h

    wwt_bf = ww.T.astype(jnp.bfloat16)           # (W1, W0), cast once here

    need = _vmem_bytes_needed(tile_h, W0, H1, W1, C1, C2)
    vmem_limit = int(min(vmem_cap, max(32 * 2 ** 20, 2 * need)))

    return pl.pallas_call(
        adfusion_kernel,
        out_shape=jax.ShapeDtypeStruct((B, C2, H0, W0), f0.dtype),
        grid=(B, n_t),
        in_specs=[
            pl.BlockSpec((1, C2, tile_h, W0), lambda b, t: (b, 0, t, 0)),
            pl.BlockSpec((1, C1, H1, W1), lambda b, t: (b, 0, 0, 0)),
            pl.BlockSpec(memory_space=pltpu.MemorySpace.SMEM),   # eff_w
            pl.BlockSpec(memory_space=pltpu.MemorySpace.SMEM),   # eff_b
            pl.BlockSpec((tile_h, H1), lambda b, t: (t, 0)),     # Wh row tile
            pl.BlockSpec((W1, W0), lambda b, t: (0, 0)),         # Ww^T (bf16)
        ],
        out_specs=pl.BlockSpec((1, C2, tile_h, W0), lambda b, t: (b, 0, t, 0)),
        scratch_shapes=[pltpu.VMEM((H1, C2 * W0), jnp.bfloat16)],  # z-cache
        compiler_params=pltpu.CompilerParams(
            dimension_semantics=("parallel", "arbitrary"),
            vmem_limit_bytes=vmem_limit),
    )(f0, f1, eff_w, eff_b, wh, wwt_bf)


def adfusion_reference(f0, f1, eff_w, eff_b, wh, ww):
    """Pure-JAX reference mirroring the kernel's precision choices (NCHW)."""
    y = jnp.einsum("ck,bkhw->bchw", eff_w, f1)
    y = jnp.maximum(y + eff_b[None, :, None, None], 0.0)
    wh_b = wh.astype(jnp.bfloat16)
    wwt_b = ww.T.astype(jnp.bfloat16)
    z = jnp.einsum("bchw,wp->bchp", y.astype(jnp.bfloat16), wwt_b,
                   preferred_element_type=jnp.float32)
    u = jnp.einsum("oh,bchp->bcop", wh_b, z.astype(jnp.bfloat16),
                   preferred_element_type=jnp.float32)
    m0 = jnp.max(f0, axis=1, keepdims=True)
    m1 = jnp.max(u, axis=1, keepdims=True)
    g = jax.nn.sigmoid(m0 + m1)
    a = f0 * g
    b = u * g
    return a * b + a + b


if __name__ == "__main__":
    # f1: low-res, input_channel1 channels; f0: high-res, input_channel2
    # channels; integer upsample factor 2.
    B = 2
    C1_in, C2_out = 4, 8          # input_channel1, input_channel2
    H1 = W1 = 8
    H0 = W0 = 16                  # scale_factor = H0 // H1 = 2

    key = jax.random.PRNGKey(0)
    k = jax.random.split(key, 8)

    # NCHW, like the PyTorch module.
    f0 = jax.random.normal(k[0], (B, C2_out, H0, W0), jnp.float32)
    f1 = jax.random.normal(k[1], (B, C1_in, H1, W1), jnp.float32)

    # Conv2d(1x1) + BatchNorm2d parameters (deterministic).
    conv_w = 0.1 * jax.random.normal(k[2], (C2_out, C1_in), jnp.float32)
    conv_b = 0.1 * jax.random.normal(k[3], (C2_out,), jnp.float32)
    bn_gamma = 1.0 + 0.1 * jax.random.normal(k[4], (C2_out,), jnp.float32)
    bn_beta = 0.1 * jax.random.normal(k[5], (C2_out,), jnp.float32)
    bn_mean = 0.1 * jax.random.normal(k[6], (C2_out,), jnp.float32)
    bn_var = 0.5 + jnp.abs(jax.random.normal(k[7], (C2_out,), jnp.float32))
    eps = 1e-5
    # TODO(synk): PyTorch BatchNorm2d in train mode uses batch statistics; this
    # implements inference-mode BN (running stats) folded into the 1x1 conv.
    scale = bn_gamma / jnp.sqrt(bn_var + eps)
    eff_w = conv_w * scale[:, None]                     # (C2, C1)
    eff_b = (conv_b - bn_mean) * scale + bn_beta        # (C2,)

    # Separable bilinear (align_corners=True) interpolation matrices.
    wh = _interp_matrix(H0, H1)                         # (H0, H1)
    ww = _interp_matrix(W0, W1)                         # (W0, W1)

    ref = adfusion_reference(f0, f1, eff_w, eff_b, wh, ww)

    # Multi-tile run (tile_h=8 -> grid (B, 2)): exercises the per-batch z-cache
    # reuse across row tiles.
    out = adfusion_pallas(f0, f1, eff_w, eff_b, wh, ww, tile_h=8)
    out = jax.block_until_ready(out)
    assert out.shape == (B, C2_out, H0, W0)
    assert jnp.allclose(out, ref, atol=2e-3, rtol=2e-3), float(
        jnp.max(jnp.abs(out - ref)))

    # Auto-tiled run (tile_h / vmem limit derived from the chip's VMEM).
    out2 = adfusion_pallas(f0, f1, eff_w, eff_b, wh, ww)
    out2 = jax.block_until_ready(out2)
    assert jnp.allclose(out2, ref, atol=2e-3, rtol=2e-3), float(
        jnp.max(jnp.abs(out2 - ref)))

    print("KERNEL_OK")
</pallas_src>

<mosaic_0001>
module attributes {stable_mosaic.version = 11 : i64} {
  func.func @adfusion_kernel(%arg0: i32, %arg1: i32, %arg2: memref<1x8x8x16xf32, #tpu.memory_space<vmem>>, %arg3: memref<1x4x8x8xf32, #tpu.memory_space<vmem>>, %arg4: memref<8x4xf32, #tpu.memory_space<smem>>, %arg5: memref<8xf32, #tpu.memory_space<smem>>, %arg6: memref<8x8xf32, #tpu.memory_space<vmem>>, %arg7: memref<8x16xbf16, #tpu.memory_space<vmem>>, %arg8: memref<1x8x8x16xf32, #tpu.memory_space<vmem>>, %arg9: memref<8x128xbf16, #tpu.memory_space<vmem>>) attributes {dimension_semantics = [#tpu.dimension_semantics<parallel>, #tpu.dimension_semantics<arbitrary>], iteration_bounds = array<i64: 2, 2>, scalar_prefetch = 0 : i64, scratch_operands = 1 : i64, tpu.core_type = #tpu.core_type<tc>, window_params = [{transform_indices = @transform_0, window_bounds = array<i64: 1, 8, 8, 16>}, {transform_indices = @transform_1, window_bounds = array<i64: 1, 4, 8, 8>}, {transform_indices = @transform_2, window_bounds = array<i64: 8, 4>}, {transform_indices = @transform_3, window_bounds = array<i64: 8>}, {transform_indices = @transform_4, window_bounds = array<i64: 8, 8>}, {pipeline_mode = #tpu.pipeline_mode<synchronous>, transform_indices = @transform_5, window_bounds = array<i64: 8, 16>}, {transform_indices = @transform_6, window_bounds = array<i64: 1, 8, 8, 16>}]} {
    %c0_i32 = arith.constant 0 : i32
    %0 = arith.cmpi eq, %arg1, %c0_i32 : i32
    %1 = arith.extui %0 : i1 to i32
    %c0_i32_0 = arith.constant 0 : i32
    %2 = arith.cmpi ne, %1, %c0_i32_0 : i32
    scf.if %2 {
      %c0_190 = arith.constant 0 : index
      %c0_191 = arith.constant 0 : index
      %c0_192 = arith.constant 0 : index
      %c0_193 = arith.constant 0 : index
      %187 = vector.load %arg3[%c0_190, %c0_191, %c0_192, %c0_193] : memref<1x4x8x8xf32, #tpu.memory_space<vmem>>, vector<1x1x8x8xf32>
      %188 = vector.shape_cast %187 : vector<1x1x8x8xf32> to vector<8x8xf32>
      %c0_194 = arith.constant 0 : index
      %c1_195 = arith.constant 1 : index
      %c0_196 = arith.constant 0 : index
      %c0_197 = arith.constant 0 : index
      %189 = vector.load %arg3[%c0_194, %c1_195, %c0_196, %c0_197] : memref<1x4x8x8xf32, #tpu.memory_space<vmem>>, vector<1x1x8x8xf32>
      %190 = vector.shape_cast %189 : vector<1x1x8x8xf32> to vector<8x8xf32>
      %c0_198 = arith.constant 0 : index
      %c2_199 = arith.constant 2 : index
      %c0_200 = arith.constant 0 : index
      %c0_201 = arith.constant 0 : index
      %191 = vector.load %arg3[%c0_198, %c2_199, %c0_200, %c0_201] : memref<1x4x8x8xf32, #tpu.memory_space<vmem>>, vector<1x1x8x8xf32>
      %192 = vector.shape_cast %191 : vector<1x1x8x8xf32> to vector<8x8xf32>
      %c0_202 = arith.constant 0 : index
      %c3_203 = arith.constant 3 : index
      %c0_204 = arith.constant 0 : index
      %c0_205 = arith.constant 0 : index
      %193 = vector.load %arg3[%c0_202, %c3_203, %c0_204, %c0_205] : memref<1x4x8x8xf32, #tpu.memory_space<vmem>>, vector<1x1x8x8xf32>
      %194 = vector.shape_cast %193 : vector<1x1x8x8xf32> to vector<8x8xf32>
      %c0_206 = arith.constant 0 : index
      %c0_207 = arith.constant 0 : index
      %195 = memref.load %arg4[%c0_206, %c0_207] : memref<8x4xf32, #tpu.memory_space<smem>>
      %196 = vector.broadcast %195 : f32 to vector<8x8xf32>
      %197 = arith.mulf %196, %188 : vector<8x8xf32>
      %c0_208 = arith.constant 0 : index
      %c1_209 = arith.constant 1 : index
      %198 = memref.load %arg4[%c0_208, %c1_209] : memref<8x4xf32, #tpu.memory_space<smem>>
      %199 = vector.broadcast %198 : f32 to vector<8x8xf32>
      %200 = arith.mulf %199, %190 : vector<8x8xf32>
      %201 = arith.addf %197, %200 : vector<8x8xf32>
      %c0_210 = arith.constant 0 : index
      %c2_211 = arith.constant 2 : index
      %202 = memref.load %arg4[%c0_210, %c2_211] : memref<8x4xf32, #tpu.memory_space<smem>>
      %203 = vector.broadcast %202 : f32 to vector<8x8xf32>
      %204 = arith.mulf %203, %192 : vector<8x8xf32>
      %205 = arith.addf %201, %204 : vector<8x8xf32>
      %c0_212 = arith.constant 0 : index
      %c3_213 = arith.constant 3 : index
      %206 = memref.load %arg4[%c0_212, %c3_213] : memref<8x4xf32, #tpu.memory_space<smem>>
      %207 = vector.broadcast %206 : f32 to vector<8x8xf32>
      %208 = arith.mulf %207, %194 : vector<8x8xf32>
      %209 = arith.addf %205, %208 : vector<8x8xf32>
      %c0_214 = arith.constant 0 : index
      %210 = memref.load %arg5[%c0_214] : memref<8xf32, #tpu.memory_space<smem>>
      %211 = vector.broadcast %210 : f32 to vector<8x8xf32>
      %212 = arith.addf %209, %211 : vector<8x8xf32>
      %cst_215 = arith.constant 0.000000e+00 : f32
      %213 = vector.broadcast %cst_215 : f32 to vector<8x8xf32>
      %214 = arith.maximumf %212, %213 : vector<8x8xf32>
      %c1_216 = arith.constant 1 : index
      %c0_217 = arith.constant 0 : index
      %215 = memref.load %arg4[%c1_216, %c0_217] : memref<8x4xf32, #tpu.memory_space<smem>>
      %216 = vector.broadcast %215 : f32 to vector<8x8xf32>
      %217 = arith.mulf %216, %188 : vector<8x8xf32>
      %c1_218 = arith.constant 1 : index
      %c1_219 = arith.constant 1 : index
      %218 = memref.load %arg4[%c1_218, %c1_219] : memref<8x4xf32, #tpu.memory_space<smem>>
      %219 = vector.broadcast %218 : f32 to vector<8x8xf32>
      %220 = arith.mulf %219, %190 : vector<8x8xf32>
      %221 = arith.addf %217, %220 : vector<8x8xf32>
      %c1_220 = arith.constant 1 : index
      %c2_221 = arith.constant 2 : index
      %222 = memref.load %arg4[%c1_220, %c2_221] : memref<8x4xf32, #tpu.memory_space<smem>>
      %223 = vector.broadcast %222 : f32 to vector<8x8xf32>
      %224 = arith.mulf %223, %192 : vector<8x8xf32>
      %225 = arith.addf %221, %224 : vector<8x8xf32>
      %c1_222 = arith.constant 1 : index
      %c3_223 = arith.constant 3 : index
      %226 = memref.load %arg4[%c1_222, %c3_223] : memref<8x4xf32, #tpu.memory_space<smem>>
      %227 = vector.broadcast %226 : f32 to vector<8x8xf32>
      %228 = arith.mulf %227, %194 : vector<8x8xf32>
      %229 = arith.addf %225, %228 : vector<8x8xf32>
      %c1_224 = arith.constant 1 : index
      %230 = memref.load %arg5[%c1_224] : memref<8xf32, #tpu.memory_space<smem>>
      %231 = vector.broadcast %230 : f32 to vector<8x8xf32>
      %232 = arith.addf %229, %231 : vector<8x8xf32>
      %cst_225 = arith.constant 0.000000e+00 : f32
      %233 = vector.broadcast %cst_225 : f32 to vector<8x8xf32>
      %234 = arith.maximumf %232, %233 : vector<8x8xf32>
      %c2_226 = arith.constant 2 : index
      %c0_227 = arith.constant 0 : index
      %235 = memref.load %arg4[%c2_226, %c0_227] : memref<8x4xf32, #tpu.memory_space<smem>>
      %236 = vector.broadcast %235 : f32 to vector<8x8xf32>
      %237 = arith.mulf %236, %188 : vector<8x8xf32>
      %c2_228 = arith.constant 2 : index
      %c1_229 = arith.constant 1 : index
      %238 = memref.load %arg4[%c2_228, %c1_229] : memref<8x4xf32, #tpu.memory_space<smem>>
      %239 = vector.broadcast %238 : f32 to vector<8x8xf32>
      %240 = arith.mulf %239, %190 : vector<8x8xf32>
      %241 = arith.addf %237, %240 : vector<8x8xf32>
      %c2_230 = arith.constant 2 : index
      %c2_231 = arith.constant 2 : index
      %242 = memref.load %arg4[%c2_230, %c2_231] : memref<8x4xf32, #tpu.memory_space<smem>>
      %243 = vector.broadcast %242 : f32 to vector<8x8xf32>
      %244 = arith.mulf %243, %192 : vector<8x8xf32>
      %245 = arith.addf %241, %244 : vector<8x8xf32>
      %c2_232 = arith.constant 2 : index
      %c3_233 = arith.constant 3 : index
      %246 = memref.load %arg4[%c2_232, %c3_233] : memref<8x4xf32, #tpu.memory_space<smem>>
      %247 = vector.broadcast %246 : f32 to vector<8x8xf32>
      %248 = arith.mulf %247, %194 : vector<8x8xf32>
      %249 = arith.addf %245, %248 : vector<8x8xf32>
      %c2_234 = arith.constant 2 : index
      %250 = memref.load %arg5[%c2_234] : memref<8xf32, #tpu.memory_space<smem>>
      %251 = vector.broadcast %250 : f32 to vector<8x8xf32>
      %252 = arith.addf %249, %251 : vector<8x8xf32>
      %cst_235 = arith.constant 0.000000e+00 : f32
      %253 = vector.broadcast %cst_235 : f32 to vector<8x8xf32>
      %254 = arith.maximumf %252, %253 : vector<8x8xf32>
      %c3_236 = arith.constant 3 : index
      %c0_237 = arith.constant 0 : index
      %255 = memref.load %arg4[%c3_236, %c0_237] : memref<8x4xf32, #tpu.memory_space<smem>>
      %256 = vector.broadcast %255 : f32 to vector<8x8xf32>
      %257 = arith.mulf %256, %188 : vector<8x8xf32>
      %c3_238 = arith.constant 3 : index
      %c1_239 = arith.constant 1 : index
      %258 = memref.load %arg4[%c3_238, %c1_239] : memref<8x4xf32, #tpu.memory_space<smem>>
      %259 = vector.broadcast %258 : f32 to vector<8x8xf32>
      %260 = arith.mulf %259, %190 : vector<8x8xf32>
      %261 = arith.addf %257, %260 : vector<8x8xf32>
      %c3_240 = arith.constant 3 : index
      %c2_241 = arith.constant 2 : index
      %262 = memref.load %arg4[%c3_240, %c2_241] : memref<8x4xf32, #tpu.memory_space<smem>>
      %263 = vector.broadcast %262 : f32 to vector<8x8xf32>
      %264 = arith.mulf %263, %192 : vector<8x8xf32>
      %265 = arith.addf %261, %264 : vector<8x8xf32>
      %c3_242 = arith.constant 3 : index
      %c3_243 = arith.constant 3 : index
      %266 = memref.load %arg4[%c3_242, %c3_243] : memref<8x4xf32, #tpu.memory_space<smem>>
      %267 = vector.broadcast %266 : f32 to vector<8x8xf32>
      %268 = arith.mulf %267, %194 : vector<8x8xf32>
      %269 = arith.addf %265, %268 : vector<8x8xf32>
      %c3_244 = arith.constant 3 : index
      %270 = memref.load %arg5[%c3_244] : memref<8xf32, #tpu.memory_space<smem>>
      %271 = vector.broadcast %270 : f32 to vector<8x8xf32>
      %272 = arith.addf %269, %271 : vector<8x8xf32>
      %cst_245 = arith.constant 0.000000e+00 : f32
      %273 = vector.broadcast %cst_245 : f32 to vector<8x8xf32>
      %274 = arith.maximumf %272, %273 : vector<8x8xf32>
      %c4_246 = arith.constant 4 : index
      %c0_247 = arith.constant 0 : index
      %275 = memref.load %arg4[%c4_246, %c0_247] : memref<8x4xf32, #tpu.memory_space<smem>>
      %276 = vector.broadcast %275 : f32 to vector<8x8xf32>
      %277 = arith.mulf %276, %188 : vector<8x8xf32>
      %c4_248 = arith.constant 4 : index
      %c1_249 = arith.constant 1 : index
      %278 = memref.load %arg4[%c4_248, %c1_249] : memref<8x4xf32, #tpu.memory_space<smem>>
      %279 = vector.broadcast %278 : f32 to vector<8x8xf32>
      %280 = arith.mulf %279, %190 : vector<8x8xf32>
      %281 = arith.addf %277, %280 : vector<8x8xf32>
      %c4_250 = arith.constant 4 : index
      %c2_251 = arith.constant 2 : index
      %282 = memref.load %arg4[%c4_250, %c2_251] : memref<8x4xf32, #tpu.memory_space<smem>>
      %283 = vector.broadcast %282 : f32 to vector<8x8xf32>
      %284 = arith.mulf %283, %192 : vector<8x8xf32>
      %285 = arith.addf %281, %284 : vector<8x8xf32>
      %c4_252 = arith.constant 4 : index
      %c3_253 = arith.constant 3 : index
      %286 = memref.load %arg4[%c4_252, %c3_253] : memref<8x4xf32, #tpu.memory_space<smem>>
      %287 = vector.broadcast %286 : f32 to vector<8x8xf32>
      %288 = arith.mulf %287, %194 : vector<8x8xf32>
      %289 = arith.addf %285, %288 : vector<8x8xf32>
      %c4_254 = arith.constant 4 : index
      %290 = memref.load %arg5[%c4_254] : memref<8xf32, #tpu.memory_space<smem>>
      %291 = vector.broadcast %290 : f32 to vector<8x8xf32>
      %292 = arith.addf %289, %291 : vector<8x8xf32>
      %cst_255 = arith.constant 0.000000e+00 : f32
      %293 = vector.broadcast %cst_255 : f32 to vector<8x8xf32>
      %294 = arith.maximumf %292, %293 : vector<8x8xf32>
      %c5_256 = arith.constant 5 : index
      %c0_257 = arith.constant 0 : index
      %295 = memref.load %arg4[%c5_256, %c0_257] : memref<8x4xf32, #tpu.memory_space<smem>>
      %296 = vector.broadcast %295 : f32 to vector<8x8xf32>
      %297 = arith.mulf %296, %188 : vector<8x8xf32>
      %c5_258 = arith.constant 5 : index
      %c1_259 = arith.constant 1 : index
      %298 = memref.load %arg4[%c5_258, %c1_259] : memref<8x4xf32, #tpu.memory_space<smem>>
      %299 = vector.broadcast %298 : f32 to vector<8x8xf32>
      %300 = arith.mulf %299, %190 : vector<8x8xf32>
      %301 = arith.addf %297, %300 : vector<8x8xf32>
      %c5_260 = arith.constant 5 : index
      %c2_261 = arith.constant 2 : index
      %302 = memref.load %arg4[%c5_260, %c2_261] : memref<8x4xf32, #tpu.memory_space<smem>>
      %303 = vector.broadcast %302 : f32 to vector<8x8xf32>
      %304 = arith.mulf %303, %192 : vector<8x8xf32>
      %305 = arith.addf %301, %304 : vector<8x8xf32>
      %c5_262 = arith.constant 5 : index
      %c3_263 = arith.constant 3 : index
      %306 = memref.load %arg4[%c5_262, %c3_263] : memref<8x4xf32, #tpu.memory_space<smem>>
      %307 = vector.broadcast %306 : f32 to vector<8x8xf32>
      %308 = arith.mulf %307, %194 : vector<8x8xf32>
      %309 = arith.addf %305, %308 : vector<8x8xf32>
      %c5_264 = arith.constant 5 : index
      %310 = memref.load %arg5[%c5_264] : memref<8xf32, #tpu.memory_space<smem>>
      %311 = vector.broadcast %310 : f32 to vector<8x8xf32>
      %312 = arith.addf %309, %311 : vector<8x8xf32>
      %cst_265 = arith.constant 0.000000e+00 : f32
      %313 = vector.broadcast %cst_265 : f32 to vector<8x8xf32>
      %314 = arith.maximumf %312, %313 : vector<8x8xf32>
      %c6_266 = arith.constant 6 : index
      %c0_267 = arith.constant 0 : index
      %315 = memref.load %arg4[%c6_266, %c0_267] : memref<8x4xf32, #tpu.memory_space<smem>>
      %316 = vector.broadcast %315 : f32 to vector<8x8xf32>
      %317 = arith.mulf %316, %188 : vector<8x8xf32>
      %c6_268 = arith.constant 6 : index
      %c1_269 = arith.constant 1 : index
      %318 = memref.load %arg4[%c6_268, %c1_269] : memref<8x4xf32, #tpu.memory_space<smem>>
      %319 = vector.broadcast %318 : f32 to vector<8x8xf32>
      %320 = arith.mulf %319, %190 : vector<8x8xf32>
      %321 = arith.addf %317, %320 : vector<8x8xf32>
      %c6_270 = arith.constant 6 : index
      %c2_271 = arith.constant 2 : index
      %322 = memref.load %arg4[%c6_270, %c2_271] : memref<8x4xf32, #tpu.memory_space<smem>>
      %323 = vector.broadcast %322 : f32 to vector<8x8xf32>
      %324 = arith.mulf %323, %192 : vector<8x8xf32>
      %325 = arith.addf %321, %324 : vector<8x8xf32>
      %c6_272 = arith.constant 6 : index
      %c3_273 = arith.constant 3 : index
      %326 = memref.load %arg4[%c6_272, %c3_273] : memref<8x4xf32, #tpu.memory_space<smem>>
      %327 = vector.broadcast %326 : f32 to vector<8x8xf32>
      %328 = arith.mulf %327, %194 : vector<8x8xf32>
      %329 = arith.addf %325, %328 : vector<8x8xf32>
      %c6_274 = arith.constant 6 : index
      %330 = memref.load %arg5[%c6_274] : memref<8xf32, #tpu.memory_space<smem>>
      %331 = vector.broadcast %330 : f32 to vector<8x8xf32>
      %332 = arith.addf %329, %331 : vector<8x8xf32>
      %cst_275 = arith.constant 0.000000e+00 : f32
      %333 = vector.broadcast %cst_275 : f32 to vector<8x8xf32>
      %334 = arith.maximumf %332, %333 : vector<8x8xf32>
      %c7_276 = arith.constant 7 : index
      %c0_277 = arith.constant 0 : index
      %335 = memref.load %arg4[%c7_276, %c0_277] : memref<8x4xf32, #tpu.memory_space<smem>>
      %336 = vector.broadcast %335 : f32 to vector<8x8xf32>
      %337 = arith.mulf %336, %188 : vector<8x8xf32>
      %c7_278 = arith.constant 7 : index
      %c1_279 = arith.constant 1 : index
      %338 = memref.load %arg4[%c7_278, %c1_279] : memref<8x4xf32, #tpu.memory_space<smem>>
      %339 = vector.broadcast %338 : f32 to vector<8x8xf32>
      %340 = arith.mulf %339, %190 : vector<8x8xf32>
      %341 = arith.addf %337, %340 : vector<8x8xf32>
      %c7_280 = arith.constant 7 : index
      %c2_281 = arith.constant 2 : index
      %342 = memref.load %arg4[%c7_280, %c2_281] : memref<8x4xf32, #tpu.memory_space<smem>>
      %343 = vector.broadcast %342 : f32 to vector<8x8xf32>
      %344 = arith.mulf %343, %192 : vector<8x8xf32>
      %345 = arith.addf %341, %344 : vector<8x8xf32>
      %c7_282 = arith.constant 7 : index
      %c3_283 = arith.constant 3 : index
      %346 = memref.load %arg4[%c7_282, %c3_283] : memref<8x4xf32, #tpu.memory_space<smem>>
      %347 = vector.broadcast %346 : f32 to vector<8x8xf32>
      %348 = arith.mulf %347, %194 : vector<8x8xf32>
      %349 = arith.addf %345, %348 : vector<8x8xf32>
      %c7_284 = arith.constant 7 : index
      %350 = memref.load %arg5[%c7_284] : memref<8xf32, #tpu.memory_space<smem>>
      %351 = vector.broadcast %350 : f32 to vector<8x8xf32>
      %352 = arith.addf %349, %351 : vector<8x8xf32>
      %cst_285 = arith.constant 0.000000e+00 : f32
      %353 = vector.broadcast %cst_285 : f32 to vector<8x8xf32>
      %354 = arith.maximumf %352, %353 : vector<8x8xf32>
      %355 = tpu.concatenate %214, %234, %254, %274, %294, %314, %334, %354 in 0 : vector<8x8xf32>, vector<8x8xf32>, vector<8x8xf32>, vector<8x8xf32>, vector<8x8xf32>, vector<8x8xf32>, vector<8x8xf32>, vector<8x8xf32> -> vector<64x8xf32>
      %356 = arith.truncf %355 : vector<64x8xf32> to vector<64x8xbf16>
      %c0_286 = arith.constant 0 : index
      %c0_287 = arith.constant 0 : index
      %357 = vector.load %arg7[%c0_286, %c0_287] : memref<8x16xbf16, #tpu.memory_space<vmem>>, vector<8x16xbf16>
      %cst_288 = arith.constant dense<0.000000e+00> : vector<64x16xf32>
      %358 = tpu.matmul %356, %357, %cst_288 {dimension_numbers = #tpu.dot_dimension_numbers<[1], [0], [0], [1], [0, 0, 1, 1], [], []>} : vector<64x8xbf16>, vector<8x16xbf16>, vector<64x16xf32> -> vector<64x16xf32>
      %359 = arith.truncf %358 : vector<64x16xf32> to vector<64x16xbf16>
      %360 = vector.extract_strided_slice %359 {offsets = [0, 0], sizes = [8, 16], strides = [1, 1]} : vector<64x16xbf16> to vector<8x16xbf16>
      %c0_289 = arith.constant 0 : index
      %c0_290 = arith.constant 0 : index
      %361 = vector.load %arg9[%c0_289, %c0_290] : memref<8x128xbf16, #tpu.memory_space<vmem>>, vector<8x16xbf16>
      tpu.vector_store %arg9[%c0_289, %c0_290], %360 {strides = array<i32>} : memref<8x128xbf16, #tpu.memory_space<vmem>>, vector<8x16xbf16>,
      %362 = vector.extract_strided_slice %359 {offsets = [8, 0], sizes = [8, 16], strides = [1, 1]} : vector<64x16xbf16> to vector<8x16xbf16>
      %c0_291 = arith.constant 0 : index
      %c16 = arith.constant 16 : index
      %363 = vector.load %arg9[%c0_291, %c16] : memref<8x128xbf16, #tpu.memory_space<vmem>>, vector<8x16xbf16>
      tpu.vector_store %arg9[%c0_291, %c16], %362 {strides = array<i32>} : memref<8x128xbf16, #tpu.memory_space<vmem>>, vector<8x16xbf16>,
      %364 = vector.extract_strided_slice %359 {offsets = [16, 0], sizes = [8, 16], strides = [1, 1]} : vector<64x16xbf16> to vector<8x16xbf16>
      %c0_292 = arith.constant 0 : index
      %c32 = arith.constant 32 : index
      %365 = vector.load %arg9[%c0_292, %c32] : memref<8x128xbf16, #tpu.memory_space<vmem>>, vector<8x16xbf16>
      tpu.vector_store %arg9[%c0_292, %c32], %364 {strides = array<i32>} : memref<8x128xbf16, #tpu.memory_space<vmem>>, vector<8x16xbf16>,
      %366 = vector.extract_strided_slice %359 {offsets = [24, 0], sizes = [8, 16], strides = [1, 1]} : vector<64x16xbf16> to vector<8x16xbf16>
      %c0_293 = arith.constant 0 : index
      %c48 = arith.constant 48 : index
      %367 = vector.load %arg9[%c0_293, %c48] : memref<8x128xbf16, #tpu.memory_space<vmem>>, vector<8x16xbf16>
      tpu.vector_store %arg9[%c0_293, %c48], %366 {strides = array<i32>} : memref<8x128xbf16, #tpu.memory_space<vmem>>, vector<8x16xbf16>,
      %368 = vector.extract_strided_slice %359 {offsets = [32, 0], sizes = [8, 16], strides = [1, 1]} : vector<64x16xbf16> to vector<8x16xbf16>
      %c0_294 = arith.constant 0 : index
      %c64 = arith.constant 64 : index
      %369 = vector.load %arg9[%c0_294, %c64] : memref<8x128xbf16, #tpu.memory_space<vmem>>, vector<8x16xbf16>
      tpu.vector_store %arg9[%c0_294, %c64], %368 {strides = array<i32>} : memref<8x128xbf16, #tpu.memory_space<vmem>>, vector<8x16xbf16>,
      %370 = vector.extract_strided_slice %359 {offsets = [40, 0], sizes = [8, 16], strides = [1, 1]} : vector<64x16xbf16> to vector<8x16xbf16>
      %c0_295 = arith.constant 0 : index
      %c80 = arith.constant 80 : index
      %371 = vector.load %arg9[%c0_295, %c80] : memref<8x128xbf16, #tpu.memory_space<vmem>>, vector<8x16xbf16>
      tpu.vector_store %arg9[%c0_295, %c80], %370 {strides = array<i32>} : memref<8x128xbf16, #tpu.memory_space<vmem>>, vector<8x16xbf16>,
      %372 = vector.extract_strided_slice %359 {offsets = [48, 0], sizes = [8, 16], strides = [1, 1]} : vector<64x16xbf16> to vector<8x16xbf16>
      %c0_296 = arith.constant 0 : index
      %c96 = arith.constant 96 : index
      %373 = vector.load %arg9[%c0_296, %c96] : memref<8x128xbf16, #tpu.memory_space<vmem>>, vector<8x16xbf16>
      tpu.vector_store %arg9[%c0_296, %c96], %372 {strides = array<i32>} : memref<8x128xbf16, #tpu.memory_space<vmem>>, vector<8x16xbf16>,
      %374 = vector.extract_strided_slice %359 {offsets = [56, 0], sizes = [8, 16], strides = [1, 1]} : vector<64x16xbf16> to vector<8x16xbf16>
      %c0_297 = arith.constant 0 : index
      %c112 = arith.constant 112 : index
      %375 = vector.load %arg9[%c0_297, %c112] : memref<8x128xbf16, #tpu.memory_space<vmem>>, vector<8x16xbf16>
      tpu.vector_store %arg9[%c0_297, %c112], %374 {strides = array<i32>} : memref<8x128xbf16, #tpu.memory_space<vmem>>, vector<8x16xbf16>,
    } else {
    }
    %c0 = arith.constant 0 : index
    %c0_1 = arith.constant 0 : index
    %3 = vector.load %arg6[%c0, %c0_1] : memref<8x8xf32, #tpu.memory_space<vmem>>, vector<8x8xf32>
    %4 = arith.truncf %3 : vector<8x8xf32> to vector<8x8xbf16>
    %c0_2 = arith.constant 0 : index
    %c0_3 = arith.constant 0 : index
    %5 = vector.load %arg9[%c0_2, %c0_3] : memref<8x128xbf16, #tpu.memory_space<vmem>>, vector<8x128xbf16>
    %cst = arith.constant dense<0.000000e+00> : vector<8x128xf32>
    %6 = tpu.matmul %4, %5, %cst {dimension_numbers = #tpu.dot_dimension_numbers<[1], [0], [0], [1], [0, 0, 1, 1], [], []>} : vector<8x8xbf16>, vector<8x128xbf16>, vector<8x128xf32> -> vector<8x128xf32>
    %7 = vector.extract_strided_slice %6 {offsets = [0, 0], sizes = [8, 16], strides = [1, 1]} : vector<8x128xf32> to vector<8x16xf32>
    %c0_4 = arith.constant 0 : index
    %c0_5 = arith.constant 0 : index
    %c0_6 = arith.constant 0 : index
    %c0_7 = arith.constant 0 : index
    %8 = vector.load %arg8[%c0_4, %c0_5, %c0_6, %c0_7] : memref<1x8x8x16xf32, #tpu.memory_space<vmem>>, vector<1x1x8x16xf32>
    %9 = vector.shape_cast %8 : vector<1x1x8x16xf32> to vector<8x16xf32>
    %10 = vector.shape_cast %7 : vector<8x16xf32> to vector<1x1x8x16xf32>
    tpu.vector_store %arg8[%c0_4, %c0_5, %c0_6, %c0_7], %10 {strides = array<i32>} : memref<1x8x8x16xf32, #tpu.memory_space<vmem>>, vector<1x1x8x16xf32>,
    %11 = vector.extract_strided_slice %6 {offsets = [0, 16], sizes = [8, 16], strides = [1, 1]} : vector<8x128xf32> to vector<8x16xf32>
    %c0_8 = arith.constant 0 : index
    %c1 = arith.constant 1 : index
    %c0_9 = arith.constant 0 : index
    %c0_10 = arith.constant 0 : index
    %12 = vector.load %arg8[%c0_8, %c1, %c0_9, %c0_10] : memref<1x8x8x16xf32, #tpu.memory_space<vmem>>, vector<1x1x8x16xf32>
    %13 = vector.shape_cast %12 : vector<1x1x8x16xf32> to vector<8x16xf32>
    %14 = vector.shape_cast %11 : vector<8x16xf32> to vector<1x1x8x16xf32>
    tpu.vector_store %arg8[%c0_8, %c1, %c0_9, %c0_10], %14 {strides = array<i32>} : memref<1x8x8x16xf32, #tpu.memory_space<vmem>>, vector<1x1x8x16xf32>,
    %15 = vector.extract_strided_slice %6 {offsets = [0, 32], sizes = [8, 16], strides = [1, 1]} : vector<8x128xf32> to vector<8x16xf32>
    %c0_11 = arith.constant 0 : index
    %c2 = arith.constant 2 : index
    %c0_12 = arith.constant 0 : index
    %c0_13 = arith.constant 0 : index
    %16 = vector.load %arg8[%c0_11, %c2, %c0_12, %c0_13] : memref<1x8x8x16xf32, #tpu.memory_space<vmem>>, vector<1x1x8x16xf32>
    %17 = vector.shape_cast %16 : vector<1x1x8x16xf32> to vector<8x16xf32>
    %18 = vector.shape_cast %15 : vector<8x16xf32> to vector<1x1x8x16xf32>
    tpu.vector_store %arg8[%c0_11, %c2, %c0_12, %c0_13], %18 {strides = array<i32>} : memref<1x8x8x16xf32, #tpu.memory_space<vmem>>, vector<1x1x8x16xf32>,
    %19 = vector.extract_strided_slice %6 {offsets = [0, 48], sizes = [8, 16], strides = [1, 1]} : vector<8x128xf32> to vector<8x16xf32>
    %c0_14 = arith.constant 0 : index
    %c3 = arith.constant 3 : index
    %c0_15 = arith.constant 0 : index
    %c0_16 = arith.constant 0 : index
    %20 = vector.load %arg8[%c0_14, %c3, %c0_15, %c0_16] : memref<1x8x8x16xf32, #tpu.memory_space<vmem>>, vector<1x1x8x16xf32>
    %21 = vector.shape_cast %20 : vector<1x1x8x16xf32> to vector<8x16xf32>
    %22 = vector.shape_cast %19 : vector<8x16xf32> to vector<1x1x8x16xf32>
    tpu.vector_store %arg8[%c0_14, %c3, %c0_15, %c0_16], %22 {strides = array<i32>} : memref<1x8x8x16xf32, #tpu.memory_space<vmem>>, vector<1x1x8x16xf32>,
    %23 = vector.extract_strided_slice %6 {offsets = [0, 64], sizes = [8, 16], strides = [1, 1]} : vector<8x128xf32> to vector<8x16xf32>
    %c0_17 = arith.constant 0 : index
    %c4 = arith.constant 4 : index
    %c0_18 = arith.constant 0 : index
    %c0_19 = arith.constant 0 : index
    %24 = vector.load %arg8[%c0_17, %c4, %c0_18, %c0_19] : memref<1x8x8x16xf32, #tpu.memory_space<vmem>>, vector<1x1x8x16xf32>
    %25 = vector.shape_cast %24 : vector<1x1x8x16xf32> to vector<8x16xf32>
    %26 = vector.shape_cast %23 : vector<8x16xf32> to vector<1x1x8x16xf32>
    tpu.vector_store %arg8[%c0_17, %c4, %c0_18, %c0_19], %26 {strides = array<i32>} : memref<1x8x8x16xf32, #tpu.memory_space<vmem>>, vector<1x1x8x16xf32>,
    %27 = vector.extract_strided_slice %6 {offsets = [0, 80], sizes = [8, 16], strides = [1, 1]} : vector<8x128xf32> to vector<8x16xf32>
    %c0_20 = arith.constant 0 : index
    %c5 = arith.constant 5 : index
    %c0_21 = arith.constant 0 : index
    %c0_22 = arith.constant 0 : index
    %28 = vector.load %arg8[%c0_20, %c5, %c0_21, %c0_22] : memref<1x8x8x16xf32, #tpu.memory_space<vmem>>, vector<1x1x8x16xf32>
    %29 = vector.shape_cast %28 : vector<1x1x8x16xf32> to vector<8x16xf32>
    %30 = vector.shape_cast %27 : vector<8x16xf32> to vector<1x1x8x16xf32>
    tpu.vector_store %arg8[%c0_20, %c5, %c0_21, %c0_22], %30 {strides = array<i32>} : memref<1x8x8x16xf32, #tpu.memory_space<vmem>>, vector<1x1x8x16xf32>,
    %31 = vector.extract_strided_slice %6 {offsets = [0, 96], sizes = [8, 16], strides = [1, 1]} : vector<8x128xf32> to vector<8x16xf32>
    %c0_23 = arith.constant 0 : index
    %c6 = arith.constant 6 : index
    %c0_24 = arith.constant 0 : index
    %c0_25 = arith.constant 0 : index
    %32 = vector.load %arg8[%c0_23, %c6, %c0_24, %c0_25] : memref<1x8x8x16xf32, #tpu.memory_space<vmem>>, vector<1x1x8x16xf32>
    %33 = vector.shape_cast %32 : vector<1x1x8x16xf32> to vector<8x16xf32>
    %34 = vector.shape_cast %31 : vector<8x16xf32> to vector<1x1x8x16xf32>
    tpu.vector_store %arg8[%c0_23, %c6, %c0_24, %c0_25], %34 {strides = array<i32>} : memref<1x8x8x16xf32, #tpu.memory_space<vmem>>, vector<1x1x8x16xf32>,
    %35 = vector.extract_strided_slice %6 {offsets = [0, 112], sizes = [8, 16], strides = [1, 1]} : vector<8x128xf32> to vector<8x16xf32>
    %c0_26 = arith.constant 0 : index
    %c7 = arith.constant 7 : index
    %c0_27 = arith.constant 0 : index
    %c0_28 = arith.constant 0 : index
    %36 = vector.load %arg8[%c0_26, %c7, %c0_27, %c0_28] : memref<1x8x8x16xf32, #tpu.memory_space<vmem>>, vector<1x1x8x16xf32>
    %37 = vector.shape_cast %36 : vector<1x1x8x16xf32> to vector<8x16xf32>
    %38 = vector.shape_cast %35 : vector<8x16xf32> to vector<1x1x8x16xf32>
    tpu.vector_store %arg8[%c0_26, %c7, %c0_27, %c0_28], %38 {strides = array<i32>} : memref<1x8x8x16xf32, #tpu.memory_space<vmem>>, vector<1x1x8x16xf32>,
    %c0_29 = arith.constant 0 : index
    %c0_30 = arith.constant 0 : index
    %c0_31 = arith.constant 0 : index
    %c0_32 = arith.constant 0 : index
    %39 = vector.load %arg2[%c0_29, %c0_30, %c0_31, %c0_32] : memref<1x8x8x16xf32, #tpu.memory_space<vmem>>, vector<1x1x8x16xf32>
    %40 = vector.shape_cast %39 : vector<1x1x8x16xf32> to vector<8x16xf32>
    %c0_33 = arith.constant 0 : index
    %c0_34 = arith.constant 0 : index
    %c0_35 = arith.constant 0 : index
    %c0_36 = arith.constant 0 : index
    %41 = vector.load %arg8[%c0_33, %c0_34, %c0_35, %c0_36] : memref<1x8x8x16xf32, #tpu.memory_space<vmem>>, vector<1x1x8x16xf32>
    %42 = vector.shape_cast %41 : vector<1x1x8x16xf32> to vector<8x16xf32>
    %c0_37 = arith.constant 0 : index
    %c1_38 = arith.constant 1 : index
    %c0_39 = arith.constant 0 : index
    %c0_40 = arith.constant 0 : index
    %43 = vector.load %arg2[%c0_37, %c1_38, %c0_39, %c0_40] : memref<1x8x8x16xf32, #tpu.memory_space<vmem>>, vector<1x1x8x16xf32>
    %44 = vector.shape_cast %43 : vector<1x1x8x16xf32> to vector<8x16xf32>
    %45 = arith.maximumf %40, %44 : vector<8x16xf32>
    %c0_41 = arith.constant 0 : index
    %c1_42 = arith.constant 1 : index
    %c0_43 = arith.constant 0 : index
    %c0_44 = arith.constant 0 : index
    %46 = vector.load %arg8[%c0_41, %c1_42, %c0_43, %c0_44] : memref<1x8x8x16xf32, #tpu.memory_space<vmem>>, vector<1x1x8x16xf32>
    %47 = vector.shape_cast %46 : vector<1x1x8x16xf32> to vector<8x16xf32>
    %48 = arith.maximumf %42, %47 : vector<8x16xf32>
    %c0_45 = arith.constant 0 : index
    %c2_46 = arith.constant 2 : index
    %c0_47 = arith.constant 0 : index
    %c0_48 = arith.constant 0 : index
    %49 = vector.load %arg2[%c0_45, %c2_46, %c0_47, %c0_48] : memref<1x8x8x16xf32, #tpu.memory_space<vmem>>, vector<1x1x8x16xf32>
    %50 = vector.shape_cast %49 : vector<1x1x8x16xf32> to vector<8x16xf32>
    %51 = arith.maximumf %45, %50 : vector<8x16xf32>
    %c0_49 = arith.constant 0 : index
    %c2_50 = arith.constant 2 : index
    %c0_51 = arith.constant 0 : index
    %c0_52 = arith.constant 0 : index
    %52 = vector.load %arg8[%c0_49, %c2_50, %c0_51, %c0_52] : memref<1x8x8x16xf32, #tpu.memory_space<vmem>>, vector<1x1x8x16xf32>
    %53 = vector.shape_cast %52 : vector<1x1x8x16xf32> to vector<8x16xf32>
    %54 = arith.maximumf %48, %53 : vector<8x16xf32>
    %c0_53 = arith.constant 0 : index
    %c3_54 = arith.constant 3 : index
    %c0_55 = arith.constant 0 : index
    %c0_56 = arith.constant 0 : index
    %55 = vector.load %arg2[%c0_53, %c3_54, %c0_55, %c0_56] : memref<1x8x8x16xf32, #tpu.memory_space<vmem>>, vector<1x1x8x16xf32>
    %56 = vector.shape_cast %55 : vector<1x1x8x16xf32> to vector<8x16xf32>
    %57 = arith.maximumf %51, %56 : vector<8x16xf32>
    %c0_57 = arith.constant 0 : index
    %c3_58 = arith.constant 3 : index
    %c0_59 = arith.constant 0 : index
    %c0_60 = arith.constant 0 : index
    %58 = vector.load %arg8[%c0_57, %c3_58, %c0_59, %c0_60] : memref<1x8x8x16xf32, #tpu.memory_space<vmem>>, vector<1x1x8x16xf32>
    %59 = vector.shape_cast %58 : vector<1x1x8x16xf32> to vector<8x16xf32>
    %60 = arith.maximumf %54, %59 : vector<8x16xf32>
    %c0_61 = arith.constant 0 : index
    %c4_62 = arith.constant 4 : index
    %c0_63 = arith.constant 0 : index
    %c0_64 = arith.constant 0 : index
    %61 = vector.load %arg2[%c0_61, %c4_62, %c0_63, %c0_64] : memref<1x8x8x16xf32, #tpu.memory_space<vmem>>, vector<1x1x8x16xf32>
    %62 = vector.shape_cast %61 : vector<1x1x8x16xf32> to vector<8x16xf32>
    %63 = arith.maximumf %57, %62 : vector<8x16xf32>
    %c0_65 = arith.constant 0 : index
    %c4_66 = arith.constant 4 : index
    %c0_67 = arith.constant 0 : index
    %c0_68 = arith.constant 0 : index
    %64 = vector.load %arg8[%c0_65, %c4_66, %c0_67, %c0_68] : memref<1x8x8x16xf32, #tpu.memory_space<vmem>>, vector<1x1x8x16xf32>
    %65 = vector.shape_cast %64 : vector<1x1x8x16xf32> to vector<8x16xf32>
    %66 = arith.maximumf %60, %65 : vector<8x16xf32>
    %c0_69 = arith.constant 0 : index
    %c5_70 = arith.constant 5 : index
    %c0_71 = arith.constant 0 : index
    %c0_72 = arith.constant 0 : index
    %67 = vector.load %arg2[%c0_69, %c5_70, %c0_71, %c0_72] : memref<1x8x8x16xf32, #tpu.memory_space<vmem>>, vector<1x1x8x16xf32>
    %68 = vector.shape_cast %67 : vector<1x1x8x16xf32> to vector<8x16xf32>
    %69 = arith.maximumf %63, %68 : vector<8x16xf32>
    %c0_73 = arith.constant 0 : index
    %c5_74 = arith.constant 5 : index
    %c0_75 = arith.constant 0 : index
    %c0_76 = arith.constant 0 : index
    %70 = vector.load %arg8[%c0_73, %c5_74, %c0_75, %c0_76] : memref<1x8x8x16xf32, #tpu.memory_space<vmem>>, vector<1x1x8x16xf32>
    %71 = vector.shape_cast %70 : vector<1x1x8x16xf32> to vector<8x16xf32>
    %72 = arith.maximumf %66, %71 : vector<8x16xf32>
    %c0_77 = arith.constant 0 : index
    %c6_78 = arith.constant 6 : index
    %c0_79 = arith.constant 0 : index
    %c0_80 = arith.constant 0 : index
    %73 = vector.load %arg2[%c0_77, %c6_78, %c0_79, %c0_80] : memref<1x8x8x16xf32, #tpu.memory_space<vmem>>, vector<1x1x8x16xf32>
    %74 = vector.shape_cast %73 : vector<1x1x8x16xf32> to vector<8x16xf32>
    %75 = arith.maximumf %69, %74 : vector<8x16xf32>
    %c0_81 = arith.constant 0 : index
    %c6_82 = arith.constant 6 : index
    %c0_83 = arith.constant 0 : index
    %c0_84 = arith.constant 0 : index
    %76 = vector.load %arg8[%c0_81, %c6_82, %c0_83, %c0_84] : memref<1x8x8x16xf32, #tpu.memory_space<vmem>>, vector<1x1x8x16xf32>
    %77 = vector.shape_cast %76 : vector<1x1x8x16xf32> to vector<8x16xf32>
    %78 = arith.maximumf %72, %77 : vector<8x16xf32>
    %c0_85 = arith.constant 0 : index
    %c7_86 = arith.constant 7 : index
    %c0_87 = arith.constant 0 : index
    %c0_88 = arith.constant 0 : index
    %79 = vector.load %arg2[%c0_85, %c7_86, %c0_87, %c0_88] : memref<1x8x8x16xf32, #tpu.memory_space<vmem>>, vector<1x1x8x16xf32>
    %80 = vector.shape_cast %79 : vector<1x1x8x16xf32> to vector<8x16xf32>
    %81 = arith.maximumf %75, %80 : vector<8x16xf32>
    %c0_89 = arith.constant 0 : index
    %c7_90 = arith.constant 7 : index
    %c0_91 = arith.constant 0 : index
    %c0_92 = arith.constant 0 : index
    %82 = vector.load %arg8[%c0_89, %c7_90, %c0_91, %c0_92] : memref<1x8x8x16xf32, #tpu.memory_space<vmem>>, vector<1x1x8x16xf32>
    %83 = vector.shape_cast %82 : vector<1x1x8x16xf32> to vector<8x16xf32>
    %84 = arith.maximumf %78, %83 : vector<8x16xf32>
    %85 = arith.addf %81, %84 : vector<8x16xf32>
    %86 = arith.negf %85 : vector<8x16xf32>
    %87 = math.exp %86 : vector<8x16xf32>
    %cst_93 = arith.constant 1.000000e+00 : f32
    %88 = vector.broadcast %cst_93 : f32 to vector<8x16xf32>
    %89 = arith.addf %88, %87 : vector<8x16xf32>
    %90 = arith.divf %88, %89 : vector<8x16xf32>
    %c0_94 = arith.constant 0 : index
    %c0_95 = arith.constant 0 : index
    %c0_96 = arith.constant 0 : index
    %c0_97 = arith.constant 0 : index
    %91 = vector.load %arg2[%c0_94, %c0_95, %c0_96, %c0_97] : memref<1x8x8x16xf32, #tpu.memory_space<vmem>>, vector<1x1x8x16xf32>
    %92 = vector.shape_cast %91 : vector<1x1x8x16xf32> to vector<8x16xf32>
    %93 = arith.mulf %92, %90 : vector<8x16xf32>
    %c0_98 = arith.constant 0 : index
    %c0_99 = arith.constant 0 : index
    %c0_100 = arith.constant 0 : index
    %c0_101 = arith.constant 0 : index
    %94 = vector.load %arg8[%c0_98, %c0_99, %c0_100, %c0_101] : memref<1x8x8x16xf32, #tpu.memory_space<vmem>>, vector<1x1x8x16xf32>
    %95 = vector.shape_cast %94 : vector<1x1x8x16xf32> to vector<8x16xf32>
    %96 = arith.mulf %95, %90 : vector<8x16xf32>
    %97 = arith.mulf %93, %96 : vector<8x16xf32>
    %98 = arith.addf %97, %93 : vector<8x16xf32>
    %99 = arith.addf %98, %96 : vector<8x16xf32>
    %c0_102 = arith.constant 0 : index
    %c0_103 = arith.constant 0 : index
    %c0_104 = arith.constant 0 : index
    %c0_105 = arith.constant 0 : index
    %100 = vector.load %arg8[%c0_102, %c0_103, %c0_104, %c0_105] : memref<1x8x8x16xf32, #tpu.memory_space<vmem>>, vector<1x1x8x16xf32>
    %101 = vector.shape_cast %100 : vector<1x1x8x16xf32> to vector<8x16xf32>
    %102 = vector.shape_cast %99 : vector<8x16xf32> to vector<1x1x8x16xf32>
    tpu.vector_store %arg8[%c0_102, %c0_103, %c0_104, %c0_105], %102 {strides = array<i32>} : memref<1x8x8x16xf32, #tpu.memory_space<vmem>>, vector<1x1x8x16xf32>,
    %c0_106 = arith.constant 0 : index
    %c1_107 = arith.constant 1 : index
    %c0_108 = arith.constant 0 : index
    %c0_109 = arith.constant 0 : index
    %103 = vector.load %arg2[%c0_106, %c1_107, %c0_108, %c0_109] : memref<1x8x8x16xf32, #tpu.memory_space<vmem>>, vector<1x1x8x16xf32>
    %104 = vector.shape_cast %103 : vector<1x1x8x16xf32> to vector<8x16xf32>
    %105 = arith.mulf %104, %90 : vector<8x16xf32>
    %c0_110 = arith.constant 0 : index
    %c1_111 = arith.constant 1 : index
    %c0_112 = arith.constant 0 : index
    %c0_113 = arith.constant 0 : index
    %106 = vector.load %arg8[%c0_110, %c1_111, %c0_112, %c0_113] : memref<1x8x8x16xf32, #tpu.memory_space<vmem>>, vector<1x1x8x16xf32>
    %107 = vector.shape_cast %106 : vector<1x1x8x16xf32> to vector<8x16xf32>
    %108 = arith.mulf %107, %90 : vector<8x16xf32>
    %109 = arith.mulf %105, %108 : vector<8x16xf32>
    %110 = arith.addf %109, %105 : vector<8x16xf32>
    %111 = arith.addf %110, %108 : vector<8x16xf32>
    %c0_114 = arith.constant 0 : index
    %c1_115 = arith.constant 1 : index
    %c0_116 = arith.constant 0 : index
    %c0_117 = arith.constant 0 : index
    %112 = vector.load %arg8[%c0_114, %c1_115, %c0_116, %c0_117] : memref<1x8x8x16xf32, #tpu.memory_space<vmem>>, vector<1x1x8x16xf32>
    %113 = vector.shape_cast %112 : vector<1x1x8x16xf32> to vector<8x16xf32>
    %114 = vector.shape_cast %111 : vector<8x16xf32> to vector<1x1x8x16xf32>
    tpu.vector_store %arg8[%c0_114, %c1_115, %c0_116, %c0_117], %114 {strides = array<i32>} : memref<1x8x8x16xf32, #tpu.memory_space<vmem>>, vector<1x1x8x16xf32>,
    %c0_118 = arith.constant 0 : index
    %c2_119 = arith.constant 2 : index
    %c0_120 = arith.constant 0 : index
    %c0_121 = arith.constant 0 : index
    %115 = vector.load %arg2[%c0_118, %c2_119, %c0_120, %c0_121] : memref<1x8x8x16xf32, #tpu.memory_space<vmem>>, vector<1x1x8x16xf32>
    %116 = vector.shape_cast %115 : vector<1x1x8x16xf32> to vector<8x16xf32>
    %117 = arith.mulf %116, %90 : vector<8x16xf32>
    %c0_122 = arith.constant 0 : index
    %c2_123 = arith.constant 2 : index
    %c0_124 = arith.constant 0 : index
    %c0_125 = arith.constant 0 : index
    %118 = vector.load %arg8[%c0_122, %c2_123, %c0_124, %c0_125] : memref<1x8x8x16xf32, #tpu.memory_space<vmem>>, vector<1x1x8x16xf32>
    %119 = vector.shape_cast %118 : vector<1x1x8x16xf32> to vector<8x16xf32>
    %120 = arith.mulf %119, %90 : vector<8x16xf32>
    %121 = arith.mulf %117, %120 : vector<8x16xf32>
    %122 = arith.addf %121, %117 : vector<8x16xf32>
    %123 = arith.addf %122, %120 : vector<8x16xf32>
    %c0_126 = arith.constant 0 : index
    %c2_127 = arith.constant 2 : index
    %c0_128 = arith.constant 0 : index
    %c0_129 = arith.constant 0 : index
    %124 = vector.load %arg8[%c0_126, %c2_127, %c0_128, %c0_129] : memref<1x8x8x16xf32, #tpu.memory_space<vmem>>, vector<1x1x8x16xf32>
    %125 = vector.shape_cast %124 : vector<1x1x8x16xf32> to vector<8x16xf32>
    %126 = vector.shape_cast %123 : vector<8x16xf32> to vector<1x1x8x16xf32>
    tpu.vector_store %arg8[%c0_126, %c2_127, %c0_128, %c0_129], %126 {strides = array<i32>} : memref<1x8x8x16xf32, #tpu.memory_space<vmem>>, vector<1x1x8x16xf32>,
    %c0_130 = arith.constant 0 : index
    %c3_131 = arith.constant 3 : index
    %c0_132 = arith.constant 0 : index
    %c0_133 = arith.constant 0 : index
    %127 = vector.load %arg2[%c0_130, %c3_131, %c0_132, %c0_133] : memref<1x8x8x16xf32, #tpu.memory_space<vmem>>, vector<1x1x8x16xf32>
    %128 = vector.shape_cast %127 : vector<1x1x8x16xf32> to vector<8x16xf32>
    %129 = arith.mulf %128, %90 : vector<8x16xf32>
    %c0_134 = arith.constant 0 : index
    %c3_135 = arith.constant 3 : index
    %c0_136 = arith.constant 0 : index
    %c0_137 = arith.constant 0 : index
    %130 = vector.load %arg8[%c0_134, %c3_135, %c0_136, %c0_137] : memref<1x8x8x16xf32, #tpu.memory_space<vmem>>, vector<1x1x8x16xf32>
    %131 = vector.shape_cast %130 : vector<1x1x8x16xf32> to vector<8x16xf32>
    %132 = arith.mulf %131, %90 : vector<8x16xf32>
    %133 = arith.mulf %129, %132 : vector<8x16xf32>
    %134 = arith.addf %133, %129 : vector<8x16xf32>
    %135 = arith.addf %134, %132 : vector<8x16xf32>
    %c0_138 = arith.constant 0 : index
    %c3_139 = arith.constant 3 : index
    %c0_140 = arith.constant 0 : index
    %c0_141 = arith.constant 0 : index
    %136 = vector.load %arg8[%c0_138, %c3_139, %c0_140, %c0_141] : memref<1x8x8x16xf32, #tpu.memory_space<vmem>>, vector<1x1x8x16xf32>
    %137 = vector.shape_cast %136 : vector<1x1x8x16xf32> to vector<8x16xf32>
    %138 = vector.shape_cast %135 : vector<8x16xf32> to vector<1x1x8x16xf32>
    tpu.vector_store %arg8[%c0_138, %c3_139, %c0_140, %c0_141], %138 {strides = array<i32>} : memref<1x8x8x16xf32, #tpu.memory_space<vmem>>, vector<1x1x8x16xf32>,
    %c0_142 = arith.constant 0 : index
    %c4_143 = arith.constant 4 : index
    %c0_144 = arith.constant 0 : index
    %c0_145 = arith.constant 0 : index
    %139 = vector.load %arg2[%c0_142, %c4_143, %c0_144, %c0_145] : memref<1x8x8x16xf32, #tpu.memory_space<vmem>>, vector<1x1x8x16xf32>
    %140 = vector.shape_cast %139 : vector<1x1x8x16xf32> to vector<8x16xf32>
    %141 = arith.mulf %140, %90 : vector<8x16xf32>
    %c0_146 = arith.constant 0 : index
    %c4_147 = arith.constant 4 : index
    %c0_148 = arith.constant 0 : index
    %c0_149 = arith.constant 0 : index
    %142 = vector.load %arg8[%c0_146, %c4_147, %c0_148, %c0_149] : memref<1x8x8x16xf32, #tpu.memory_space<vmem>>, vector<1x1x8x16xf32>
    %143 = vector.shape_cast %142 : vector<1x1x8x16xf32> to vector<8x16xf32>
    %144 = arith.mulf %143, %90 : vector<8x16xf32>
    %145 = arith.mulf %141, %144 : vector<8x16xf32>
    %146 = arith.addf %145, %141 : vector<8x16xf32>
    %147 = arith.addf %146, %144 : vector<8x16xf32>
    %c0_150 = arith.constant 0 : index
    %c4_151 = arith.constant 4 : index
    %c0_152 = arith.constant 0 : index
    %c0_153 = arith.constant 0 : index
    %148 = vector.load %arg8[%c0_150, %c4_151, %c0_152, %c0_153] : memref<1x8x8x16xf32, #tpu.memory_space<vmem>>, vector<1x1x8x16xf32>
    %149 = vector.shape_cast %148 : vector<1x1x8x16xf32> to vector<8x16xf32>
    %150 = vector.shape_cast %147 : vector<8x16xf32> to vector<1x1x8x16xf32>
    tpu.vector_store %arg8[%c0_150, %c4_151, %c0_152, %c0_153], %150 {strides = array<i32>} : memref<1x8x8x16xf32, #tpu.memory_space<vmem>>, vector<1x1x8x16xf32>,
    %c0_154 = arith.constant 0 : index
    %c5_155 = arith.constant 5 : index
    %c0_156 = arith.constant 0 : index
    %c0_157 = arith.constant 0 : index
    %151 = vector.load %arg2[%c0_154, %c5_155, %c0_156, %c0_157] : memref<1x8x8x16xf32, #tpu.memory_space<vmem>>, vector<1x1x8x16xf32>
    %152 = vector.shape_cast %151 : vector<1x1x8x16xf32> to vector<8x16xf32>
    %153 = arith.mulf %152, %90 : vector<8x16xf32>
    %c0_158 = arith.constant 0 : index
    %c5_159 = arith.constant 5 : index
    %c0_160 = arith.constant 0 : index
    %c0_161 = arith.constant 0 : index
    %154 = vector.load %arg8[%c0_158, %c5_159, %c0_160, %c0_161] : memref<1x8x8x16xf32, #tpu.memory_space<vmem>>, vector<1x1x8x16xf32>
    %155 = vector.shape_cast %154 : vector<1x1x8x16xf32> to vector<8x16xf32>
    %156 = arith.mulf %155, %90 : vector<8x16xf32>
    %157 = arith.mulf %153, %156 : vector<8x16xf32>
    %158 = arith.addf %157, %153 : vector<8x16xf32>
    %159 = arith.addf %158, %156 : vector<8x16xf32>
    %c0_162 = arith.constant 0 : index
    %c5_163 = arith.constant 5 : index
    %c0_164 = arith.constant 0 : index
    %c0_165 = arith.constant 0 : index
    %160 = vector.load %arg8[%c0_162, %c5_163, %c0_164, %c0_165] : memref<1x8x8x16xf32, #tpu.memory_space<vmem>>, vector<1x1x8x16xf32>
    %161 = vector.shape_cast %160 : vector<1x1x8x16xf32> to vector<8x16xf32>
    %162 = vector.shape_cast %159 : vector<8x16xf32> to vector<1x1x8x16xf32>
    tpu.vector_store %arg8[%c0_162, %c5_163, %c0_164, %c0_165], %162 {strides = array<i32>} : memref<1x8x8x16xf32, #tpu.memory_space<vmem>>, vector<1x1x8x16xf32>,
    %c0_166 = arith.constant 0 : index
    %c6_167 = arith.constant 6 : index
    %c0_168 = arith.constant 0 : index
    %c0_169 = arith.constant 0 : index
    %163 = vector.load %arg2[%c0_166, %c6_167, %c0_168, %c0_169] : memref<1x8x8x16xf32, #tpu.memory_space<vmem>>, vector<1x1x8x16xf32>
    %164 = vector.shape_cast %163 : vector<1x1x8x16xf32> to vector<8x16xf32>
    %165 = arith.mulf %164, %90 : vector<8x16xf32>
    %c0_170 = arith.constant 0 : index
    %c6_171 = arith.constant 6 : index
    %c0_172 = arith.constant 0 : index
    %c0_173 = arith.constant 0 : index
    %166 = vector.load %arg8[%c0_170, %c6_171, %c0_172, %c0_173] : memref<1x8x8x16xf32, #tpu.memory_space<vmem>>, vector<1x1x8x16xf32>
    %167 = vector.shape_cast %166 : vector<1x1x8x16xf32> to vector<8x16xf32>
    %168 = arith.mulf %167, %90 : vector<8x16xf32>
    %169 = arith.mulf %165, %168 : vector<8x16xf32>
    %170 = arith.addf %169, %165 : vector<8x16xf32>
    %171 = arith.addf %170, %168 : vector<8x16xf32>
    %c0_174 = arith.constant 0 : index
    %c6_175 = arith.constant 6 : index
    %c0_176 = arith.constant 0 : index
    %c0_177 = arith.constant 0 : index
    %172 = vector.load %arg8[%c0_174, %c6_175, %c0_176, %c0_177] : memref<1x8x8x16xf32, #tpu.memory_space<vmem>>, vector<1x1x8x16xf32>
    %173 = vector.shape_cast %172 : vector<1x1x8x16xf32> to vector<8x16xf32>
    %174 = vector.shape_cast %171 : vector<8x16xf32> to vector<1x1x8x16xf32>
    tpu.vector_store %arg8[%c0_174, %c6_175, %c0_176, %c0_177], %174 {strides = array<i32>} : memref<1x8x8x16xf32, #tpu.memory_space<vmem>>, vector<1x1x8x16xf32>,
    %c0_178 = arith.constant 0 : index
    %c7_179 = arith.constant 7 : index
    %c0_180 = arith.constant 0 : index
    %c0_181 = arith.constant 0 : index
    %175 = vector.load %arg2[%c0_178, %c7_179, %c0_180, %c0_181] : memref<1x8x8x16xf32, #tpu.memory_space<vmem>>, vector<1x1x8x16xf32>
    %176 = vector.shape_cast %175 : vector<1x1x8x16xf32> to vector<8x16xf32>
    %177 = arith.mulf %176, %90 : vector<8x16xf32>
    %c0_182 = arith.constant 0 : index
    %c7_183 = arith.constant 7 : index
    %c0_184 = arith.constant 0 : index
    %c0_185 = arith.constant 0 : index
    %178 = vector.load %arg8[%c0_182, %c7_183, %c0_184, %c0_185] : memref<1x8x8x16xf32, #tpu.memory_space<vmem>>, vector<1x1x8x16xf32>
    %179 = vector.shape_cast %178 : vector<1x1x8x16xf32> to vector<8x16xf32>
    %180 = arith.mulf %179, %90 : vector<8x16xf32>
    %181 = arith.mulf %177, %180 : vector<8x16xf32>
    %182 = arith.addf %181, %177 : vector<8x16xf32>
    %183 = arith.addf %182, %180 : vector<8x16xf32>
    %c0_186 = arith.constant 0 : index
    %c7_187 = arith.constant 7 : index
    %c0_188 = arith.constant 0 : index
    %c0_189 = arith.constant 0 : index
    %184 = vector.load %arg8[%c0_186, %c7_187, %c0_188, %c0_189] : memref<1x8x8x16xf32, #tpu.memory_space<vmem>>, vector<1x1x8x16xf32>
    %185 = vector.shape_cast %184 : vector<1x1x8x16xf32> to vector<8x16xf32>
    %186 = vector.shape_cast %183 : vector<8x16xf32> to vector<1x1x8x16xf32>
    tpu.vector_store %arg8[%c0_186, %c7_187, %c0_188, %c0_189], %186 {strides = array<i32>} : memref<1x8x8x16xf32, #tpu.memory_space<vmem>>, vector<1x1x8x16xf32>,
    return
  }
  func.func @transform_0(%arg0: i32, %arg1: i32) -> (i32, i32, i32, i32) {
    %c0_i32 = arith.constant 0 : i32
    %c0_i32_0 = arith.constant 0 : i32
    %c0_i32_1 = arith.constant 0 : i32
    return %arg0, %c0_i32, %arg1, %c0_i32_0 : i32, i32, i32, i32
  }
  func.func @transform_1(%arg0: i32, %arg1: i32) -> (i32, i32, i32, i32) {
    %c0_i32 = arith.constant 0 : i32
    %c0_i32_0 = arith.constant 0 : i32
    %c0_i32_1 = arith.constant 0 : i32
    %c0_i32_2 = arith.constant 0 : i32
    return %arg0, %c0_i32, %c0_i32_0, %c0_i32_1 : i32, i32, i32, i32
  }
  func.func @transform_2(%arg0: i32, %arg1: i32) -> (i32, i32) {
    %c0_i32 = arith.constant 0 : i32
    %c0_i32_0 = arith.constant 0 : i32
    %c0_i32_1 = arith.constant 0 : i32
    return %c0_i32, %c0_i32_0 : i32, i32
  }
  func.func @transform_3(%arg0: i32, %arg1: i32) -> i32 {
    %c0_i32 = arith.constant 0 : i32
    %c0_i32_0 = arith.constant 0 : i32
    return %c0_i32 : i32
  }
  func.func @transform_4(%arg0: i32, %arg1: i32) -> (i32, i32) {
    %c0_i32 = arith.constant 0 : i32
    %c0_i32_0 = arith.constant 0 : i32
    return %arg1, %c0_i32 : i32, i32
  }
  func.func @transform_5(%arg0: i32, %arg1: i32) -> (i32, i32) {
    %c0_i32 = arith.constant 0 : i32
    %c0_i32_0 = arith.constant 0 : i32
    %c0_i32_1 = arith.constant 0 : i32
    return %c0_i32, %c0_i32_0 : i32, i32
  }
  func.func @transform_6(%arg0: i32, %arg1: i32) -> (i32, i32, i32, i32) {
    %c0_i32 = arith.constant 0 : i32
    %c0_i32_0 = arith.constant 0 : i32
    %c0_i32_1 = arith.constant 0 : i32
    return %arg0, %c0_i32, %arg1, %c0_i32_0 : i32, i32, i32, i32
  }
}

</mosaic_0001>

<bundles_post_ra>
// kernel: tpu_custom_call.1
= control target key start
LH: loop header
LB: loop body
LE: loop exit
PB: predicated region body
PF: predicated region fallthrough
CT: control target
= control target key end

     0   :  { %s2045_s0 = inlined_call_operand.hbm [shape: f32[2,8,16,16], index: 0, kind: input, shape index: {}]   ;;  %s2046_s1 = inlined_call_operand.hbm [shape: f32[2,4,8,8], index: 1, kind: input, shape index: {}]   ;;  %s2047_s2 = inlined_call_operand.vmem [shape: f32[8,4], index: 2, kind: input, shape index: {}]   ;;  %s2048_s3 = inlined_call_operand.vmem [shape: f32[8], index: 3, kind: input, shape index: {}]   ;;  %s2049_s4 = inlined_call_operand.vmem [shape: f32[16,8], index: 4, kind: input, shape index: {}]   ;;  %s2050_s5 = inlined_call_operand.vmem [shape: bf16[8,16], index: 5, kind: input, shape index: {}]   ;;  %s2051_s6 = inlined_call_operand.hbm [shape: f32[2,8,16,16], index: 6, kind: output, shape index: {}]  }
   0x1   :  { %2068 = sst [smem:[#allocation24_spill]] %s2047_s2 }
   0x2   :  { %2069 = sst [smem:[#allocation25_spill]] %s2048_s3 }
   0x3   :  { %2070 = sst [smem:[#allocation26_spill]] %s2049_s4 }
   0x4   :  { %2071 = sst [smem:[#allocation27_spill]] %s2050_s5 }
   0x5   :  { %2072 = sst [smem:[#allocation28_spill]] %s2051_s6 }
   0x6   :  { %11 = vsyncpa [#allocation4], 0 }
   0x7   :  { %13 = vsyncpa [#allocation4 + $0x1], 0 }
   0x8   :  { %14 = vsyncpa [#allocation8], 0 }
   0x9   :  { %16 = vsyncpa [#allocation8 + $0x1], 0 }
   0xa   :  { %17 = vsyncpa [#allocation6], 0 }
   0xb   :  { %18 = vsyncpa [#allocation11], 0 }
   0xc   :  { %19 = vsyncpa [#allocation5], 0 }
   0xd   :  { %21 = vsyncpa [#allocation5 + $0x1], 0  ;;  %s1628_s21 = smov 0   ;;  %s1630_s22 = smov 0  }
   0xe   :  { %s1632_s23 = smov 0   ;;  %s1634_s24 = smov 0  }
   0xf   :  { %s1636_s25 = smov 0   ;;  %s1638_s26 = smov 0  }
  0x10   :  { %s1640_s27 = smov 0   ;;  %s1642_s28 = smov 0  }
  0x11   :  { %s1644_s29 = smov 0   ;;  %s1646_s30 = smov 0  }
  0x12   :  { %s1648_s7 = smov 0  }
  0x13 LB: > { %2073 = sst [smem:[#allocation18_spill]] %s1536_s24  ;;  %s1036_s8 = sadd.s32 4294967295, %s1564_s7   ;;  %s1564_s7 = sphi %s1648_s7, %s27_s7   ;;  %s1560_s30 = sphi %s1646_s30, %s2119_s30   ;;  %s1556_s29 = sphi %s1644_s29, %s2118_s29   ;;  %s1552_s28 = sphi %s1642_s28, %s2117_s28   ;;  %s1548_s27 = sphi %s1640_s27, %s2116_s27   ;;  %s1544_s26 = sphi %s1638_s26, %s2115_s26   ;;  %s1540_s25 = sphi %s1636_s25, %s2114_s25   ;;  %s1536_s24 = sphi %s1634_s24, %s2113_s24   ;;  %s1532_s23 = sphi %s1632_s23, %s2112_s23   ;;  %s1528_s22 = sphi %s1630_s22, %s2111_s22   ;;  %s1524_s21 = sphi %s1628_s21, %s2110_s21  }
  0x14   : > { %2074 = sst [smem:[#allocation19_spill]] %s1548_s27  ;;  %s1037_s9 = sadd.s32 4294967294, %s1564_s7  }
  0x15   : > { %2075 = sst [smem:[#allocation20_spill]] %s1552_s28  ;;  %p55_p0 = scmp.ne.s32.totalorder %s1544_s26, %s1540_s25 }
  0x16   : > { %p2052_p1 = scmp.eq.s32.totalorder %s1564_s7, 0  ;;  %p61_p2 = scmp.ne.s32.totalorder %s1540_s25, %s1536_s24 }
  0x17   : > { %p1688_p3 = scmp.eq.s32.totalorder %s1036_s8, 0  ;;  %p87_p5 = scmp.ne.s32.totalorder %s1528_s22, %s1524_s21 }
  0x18   : > { %p1694_p4 = por %p2052_p1, %p55_p0  ;;  %p202_p7 = scmp.eq.s32.totalorder %s1036_s8, 3 }
  0x19   : > { %s2076_s10 = scalar_select %p1688_p3, 1, 0 }
  0x1a   : > { %p1701_p6 = por %p1688_p3, %p61_p2  ;;  %p1707_p8 = por %p87_p5, %p1688_p3 }
  0x1b   : > { %p208_p9 = scmp.eq.s32.totalorder %s1037_s9, 3  ;;  %p1711_p10 = por %p202_p7, %p55_p0 }
  0x1c   : > { %s2078_s12 = scalar_select %p1701_p6, 1, 0 }
  0x1d   : > { %s2079_s13 = scalar_select %p1707_p8, 1, 0 }
  0x1e   : > { %s2080_s14 = scalar_select %p1711_p10, 1, 0 }
  0x1f   : > { %p1038_p11 = scmp.ge.s32.totalorder %s1564_s7, 1  ;;  %p1716_p12 = por %p208_p9, %p61_p2 }
  0x20   : > { %2081 = sst [smem:[#allocation21_spill]] %s2080_s14  ;;  %p215_p13 = scmp.lt.s32.totalorder %s1564_s7, 5 }
  0x21   : > { %s2082_s15 = scalar_select %p1716_p12, 1, 0 }
  0x22   : > { %s2084_s2 = sld [smem:[#allocation24_spill]]  ;;  %p1724_p1 = pnand %p1038_p11, %p215_p13 }
  0x23   : > { %2083 = sst [smem:[#allocation22_spill]] %s2082_s15  ;;  %p2057_p5 = scmp.lt.s32.totalorder %s1564_s7, 4 }
  0x24   : > { %s2085_s19 = scalar_select %p1724_p1, 1, 0 }
  0x25   : > { %p1206_p0 = pneg %p1724_p1  ;;  %s2086_s3 = sld [smem:[#allocation25_spill]] }
  0x26   : > { %p1744_p7 = pnand %p2057_p5, %p1694_p4 }
  0x27   : > { %p1736_p2 = pnand %p1206_p0, %p1688_p3 }
  0x28   : > { %s228_s18 = sshll.u32 %s2084_s2, 4  ;;  %s229_s18 = int_to_ptr.vmem [resolvable:$true] %s228_s18 }
  0x29   : > { %s2088_s16 = scalar_select %p1744_p7, 1, 0 }
  0x2a   : > { %s1346_s17 = scalar_lea.vmem %s229_s18, 128  ;;  %p1348_p11 = pneg %p1736_p2 }
  0x2b   : > { %s239_s8 = sshll.u32 %s2086_s3, 4  ;;  %p1347_p9 = scmp.ne.s32.totalorder %s229_s18, %s1346_s17  ;;  %s240_s8 = int_to_ptr.vmem [resolvable:$true] %s239_s8 }
  0x2c   : > { %p1354_p10 = scmp.lt.s32.totalorder %s229_s18, %s229_s18  ;;  %p1355_p8 = scmp.lt.s32.totalorder %s1346_s17, %s1346_s17 }
  0x2d   : > { %p1349_p13 = pnand %p1348_p11, %p1347_p9 }
  0x2e   : > { %p1356_p0 = por %p1355_p8, %p1354_p10 }
  0x2f   : > { %p1350_p12 = pneg %p1349_p13 }
  0x31   : > { %p1357_p3 = pnand %p1356_p0, %p1350_p12 }
  0x33   : > { %1360 = shalt.err (!%p1357_p3)
}
  0x34   : > { %s1566_s20 = smov [#allocation9]   ;;  %s1361_s11 = scalar_lea.vmem %s240_s8, 16 }
  0x35   : > { %1209 = dma.vmem_to_smem (!%p1736_p2), %s229_s18, 128, %s1566_s20, [#allocation6]  }
  0x36   : > { %p1362_p4 = scmp.ne.s32.totalorder %s240_s8, %s1361_s11  ;;  %p1369_p1 = scmp.lt.s32.totalorder %s240_s8, %s240_s8 }
  0x37   : > { %p1370_p7 = scmp.lt.s32.totalorder %s1361_s11, %s1361_s11 }
  0x38   : > { %p1364_p5 = pnand %p1362_p4, %p1348_p11 }
  0x39   : > { %p1371_p9 = por %p1370_p7, %p1369_p1 }
  0x3a   : > { %p1365_p6 = pneg %p1364_p5 }
  0x3c   : > { %p1372_p13 = pnand %p1371_p9, %p1365_p6 }
  0x3e   : > { %1375 = shalt.err (!%p1372_p13)
}
  0x3f   : > { %s1567_s21 = smov [#allocation10]   ;;  %s36_s18 = sadd.s32 1, %s1556_s29 }
  0x40   : > { %1212 = dma.vmem_to_smem (!%p1736_p2), %s240_s8, 16, %s1567_s21, [#allocation11]  }
  0x41   : > { %p37_p3 = scmp.ge.s32.totalorder %s36_s18, 2  ;;  %s39_s17 = sadd.s32 1, %s1560_s30 }
  0x42   : > { %s48_s20 = sadd.s32 1, %s1544_s26  ;;  %s253_s11 = sand.u32 1, %s1544_s26  }
  0x43   : > { %s2121_s18 = smov (%p37_p3, %s36_s18), 0  ;;  %s2123_s17 = smov (!%p37_p3, %s39_s17), %s1560_s30 }
  0x44   : > { %2089 = sst [smem:[#allocation23_spill]] %s2121_s18  ;;  %s44_s9 = ssub.s32 %s1556_s29, %s2121_s18 }
  0x45   : > { %p41_p1 = scmp.ge.s32.totalorder %s2123_s17, 2  ;;  %s1042_s2 = sshll.u32 %s253_s11, 6 }
  0x46   : > { %s1043_s3 = sshll.u32 %s1560_s30, 4  ;;  %s257_s21 = scalar_lea.vmem [#allocation3], %s1042_s2 }
  0x47   : > { %s2125_s17 = smov (%p41_p1, %s2123_s17), 0  ;;  %s262_s8 = sadd.s32 %s1556_s29, %s1043_s3 }
  0x48   : > { %s265_s15 = sshll.u32 %s257_s21, 4  ;;  %s1769_s24 = ssub.s32 %s1560_s30, %s2125_s17  ;;  %s266_s15 = int_to_ptr.vmem [resolvable:$true] %s265_s15 }
  0x49   : > { %s1044_s6 = sshll.u32 %s262_s8, 7  ;;  %s45_s14 = sor.u32 %s44_s9, %s1769_s24 }
  0x4a   : > { %p72_p6 = scmp.eq.s32.totalorder %s1769_s24, 0  ;;  %p46_p8 = scmp.eq.s32.totalorder %s45_s14, 0 }
  0x4b   : > { %s264_s5 = scalar_lea.hbm %s2045_s0, %s1044_s6  ;;  %s254_s27 = scalar_lea.sflag [#allocation4], %s253_s11 }
  0x4c   : > { %s1777_s4 = scalar_select %p46_p8, %s1544_s26, %s48_s20  }
  0x4d   : > { %p2090_p10 = scmp.ne.s32.totalorder %s2088_s16, 0  ;;  %s1389_s2 = scalar_lea.vmem %s266_s15, 1024 }
  0x4e   : > { %p1390_p5 = scmp.ne.s32.totalorder %s266_s15, %s1389_s2  ;;  %s1568_s3 = smov [#allocation3]  }
  0x4f   : > { %p1378_p12 = pneg %p2090_p10  ;;  %s1394_s21 = sshll.u32 %s1568_s3, 4  ;;  %s1395_s21 = int_to_ptr.vmem [resolvable:$false] %s1394_s21 }
  0x50   : > { %s1396_s9 = scalar_lea.vmem %s1395_s21, 2048  ;;  %p1397_p11 = scmp.lt.s32.totalorder %s266_s15, %s1395_s21 }
  0x51   : > { %p1392_p2 = pnand %p1390_p5, %p1378_p12  ;;  %p1398_p0 = scmp.lt.s32.totalorder %s1396_s9, %s1389_s2 }
  0x53   : > { %p1393_p7 = pneg %p1392_p2  ;;  %p1399_p4 = por %p1398_p0, %p1397_p11 }
  0x55   : > { %p1400_p9 = pnand %p1399_p4, %p1393_p7 }
  0x57   : > { %1403 = shalt.err (!%p1400_p9)
}
  0x58   : > { %s1569_s6 = smov 256   ;;  %s1570_s28 = smov 128  }
  0x59   : > { %s1571_s14 = smov 8   ;;  %s1157_s18 = sshll.u32 %s1560_s30, 9 }
  0x5a   : > { %1216 = dma.hbm_to_vmem [thread:$0]  (!%p2090_p10), %s264_s5, 1024, %s266_s15, %s254_s27, %s1569_s6, %s1570_s28, %s1571_s14  }
  0x5b   : > { %s1789_s8 = scalar_lea.hbm %s2046_s1, %s1157_s18  ;;  %s74_s2 = sadd.s32 1, %s1532_s23 }
  0x5c   : > { %p81_p13 = scmp.ne.s32.totalorder %s1532_s23, %s1528_s22  ;;  %p2091_p3 = scmp.eq.s32.totalorder %s1564_s7, 0 }
  0x5d   : > { %s1797_s3 = scalar_select %p72_p6, %s1532_s23, %s74_s2  }
  0x5e   : > { %p83_p1 = por %p81_p13, %p2091_p3  ;;  %s275_s21 = sand.u32 1, %s1532_s23  }
  0x5f   : > { %s1045_s9 = sshll.u32 %s275_s21, 5  ;;  %p2092_p8 = scmp.lt.s32.totalorder %s1564_s7, 4 }
  0x60   : > { %s279_s5 = scalar_lea.vmem [#allocation7], %s1045_s9  ;;  %s276_s15 = scalar_lea.sflag [#allocation8], %s275_s21 }
  0x61   : > { %p1804_p12 = pnand %p2092_p8, %p83_p1  ;;  %s286_s27 = sshll.u32 %s279_s5, 4  ;;  %s287_s27 = int_to_ptr.vmem [resolvable:$true] %s286_s27 }
  0x62   : > { %s1417_s6 = scalar_lea.vmem %s287_s27, 512  ;;  %s1572_s24 = smov [#allocation7]  }
  0x63   : > { %p1406_p10 = pneg %p1804_p12  ;;  %p1418_p5 = scmp.ne.s32.totalorder %s287_s27, %s1417_s6 }
  0x64   : > { %s1422_s18 = sshll.u32 %s1572_s24, 4  ;;  %s1423_s18 = int_to_ptr.vmem [resolvable:$false] %s1422_s18 }
  0x65   : > { %p1420_p6 = pnand %p1418_p5, %p1406_p10  ;;  %s1424_s20 = scalar_lea.vmem %s1423_s18, 1024 }
  0x66   : > { %p1425_p7 = scmp.lt.s32.totalorder %s287_s27, %s1423_s18  ;;  %p1426_p11 = scmp.lt.s32.totalorder %s1424_s20, %s1417_s6 }
  0x67   : > { %p1421_p2 = pneg %p1420_p6 }
  0x68   : > { %p1427_p0 = por %p1426_p11, %p1425_p7 }
  0x6a   : > { %p1428_p4 = pnand %p1427_p0, %p1421_p2 }
  0x6c   : > { %1431 = shalt.err (!%p1428_p4)
}
  0x6d   : > { %1219 = dma.hbm_to_vmem [thread:$0]  (!%p1804_p12), %s1789_s8, 512, %s287_s27, %s276_s15, %s1570_s28, %s1570_s28, %s1571_s14  }
  0x6e   : > { %p2094_p9 = scmp.ne.s32.totalorder %s2085_s19, 0 }
  0x6f   : > { %s1819_s11 = sand.u32 (!%p2094_p9), 1, %s1540_s25   ;;  %p2095_p13 = scmp.ne.s32.totalorder (!%p2094_p9), %s2078_s12, 0 }
  0x70   : > { %305 = sbr.rel (%p2094_p9) target bundleno = 925 (0x39d), region = 44  ;;  %s1049_s2 = sshll.u32 (!%p2094_p9), %s1819_s11, 6 }
  0x71   : > { %s308_s21 = scalar_lea.sflag (!%p2094_p9), [#allocation4], %s1819_s11  ;;  %s1823_s9 = scalar_lea.vmem (!%p2094_p9), [#allocation3], %s1049_s2 }
  0x75   : > { %1503 = dma.done.wait (%p2095_p13), %s308_s21, 1024  }
  0x76   : > { %1505 = vsyncadd (%p2095_p13), %s308_s21, 4294966272  ;;  %s316_s28 = sand.u32 1, %s1528_s22   ;;  %p2096_p3 = scmp.ne.s32.totalorder %s2079_s13, 0 }
  0x77   : > { %s1050_s19 = sshll.u32 %s316_s28, 5  ;;  %s317_s14 = scalar_lea.sflag [#allocation8], %s316_s28 }
  0x78   : > { %s1830_s8 = scalar_lea.vmem [#allocation7], %s1050_s19 }
  0x79   : > { %1507 = dma.done.wait (%p2096_p3), %s317_s14, 512  }
  0x7a   : > { %1509 = vsyncadd (%p2096_p3), %s317_s14, 4294966784  ;;  %p2097_p1 = scmp.ne.s32.totalorder %s2076_s10, 0 }
  0x7c   : > { %1511 = dma.done.wait (%p2097_p1), [#allocation6], 128  }
  0x7d   : > { %1513 = vsyncadd (%p2097_p1), [#allocation6], 4294967168 }
  0x7e   : > { %1515 = dma.done.wait (%p2097_p1), [#allocation11], 16  }
  0x7f   : > { %1517 = vsyncadd (%p2097_p1), [#allocation11], 4294967280 }
  0x80   : > { %333 = sfence }
  0x81   : > { %s2098_s12 = sld [smem:[#allocation19_spill]]  ;;  %s1851_s24 = scalar_lea.vmem [#allocation12], %s1049_s2 }
  0x82   : > { %s2099_s15 = sld [smem:[#allocation26_spill]] }
  0x87   : > { %p367_p8 = scmp.lt.s32.totalorder %s2098_s12, 1  ;;  %p1055_p12 = scmp.ne.s32.totalorder %s2098_s12, 0 }
  0x88   : > { %s2100_s10 = sld [smem:[#allocation27_spill]] (!%p1055_p12) }
  0x89   : > { %s368_s16 = scalar_select %p367_p8, %s2098_s12, 1 }
  0x8a   : > { %375 = sbr.rel (%p1055_p12) target bundleno = 517 (0x205), region = 64  ;;  %s383_s21 = sld [smem:[#allocation9]] (!%p1055_p12) }
  0x8b   : > { %s1054_s5 = sshll.u32 %s368_s16, 3  ;;  %s1059_s2 = sld [smem:[#allocation9 + $0x1]] (!%p1055_p12) }
  0x8c   : > { %s1849_s6 = scalar_lea.vmem %s2099_s15, %s1054_s5  ;;  %s1060_s28 = sld [smem:[#allocation9 + $0x2]] (!%p1055_p12) }
  0x8d   : > { %s1061_s19 = sld [smem:[#allocation9 + $0x3]] (!%p1055_p12) }
  0x8e   : > { %s1860_s14 = sld [smem:[#allocation10]] (!%p1055_p12) }
  0x8f   : > { %v539_v0 = vld [vmem:[%s2100_s10] sm:$0xf]  ;;  %vm553_vm0 = vcmask 1043456   ;;  %v1858_v2 = vld [vmem:[%s1830_s8] sm:$0xff]  ;;  %v1863_v3 = vld [vmem:[%s1830_s8 + $0x8] sm:$0xff]  ;;  %s1062_s12 = sld [smem:[#allocation9 + $0x80]] }
  0x90   : > { %1190 = vmatprep.subr.msk.bf16.mxu0 %vm553_vm0, %v539_v0  ;;  %1191 = vmatprep.subr.msk.bf16.mxu1 %vm553_vm0, %v539_v0  ;;  %v555_v1 = vsel %vm553_vm0, %v539_v0, 0  ;;  %v1866_v4 = vld [vmem:[%s1830_s8 + $0x10] sm:$0xff]  ;;  %v384_v5 = vstv %s383_s21  ;;  %s1063_s16 = sld [smem:[#allocation9 + $0x81]]  ;;  %v1869_v6 = vld [vmem:[%s1830_s8 + $0x18] sm:$0xff]  ;;  %vm540_vm1 = vcmask 64512   ;;  %vm626_vm2 = vcmask 125952  }
  0x91   : > { %1173 = vmatpush3.bf16.msra.mxu0 %v555_v1  ;;  %1189 = vmatpush3.bf16.msra.mxu1 %v555_v1  ;;  %v385_v7 = vmul.f32 %v384_v5, %v1858_v2  ;;  %v387_v8 = vstv %s1059_s2  ;;  %s1064_s5 = sld [smem:[#allocation9 + $0x82]]  ;;  %vm634_vm3 = vcmask 257152   ;;  %vm642_vm4 = vcmask 388352  }
  0x92   : > { %v388_v9 = vmul.f32 %v1863_v3, %v387_v8  ;;  %v391_v10 = vstv %s1060_s28  ;;  %s1065_s13 = sld [smem:[#allocation9 + $0x83]]  ;;  %vm649_vm5 = vcmask 519552   ;;  %vm657_vm6 = vcmask 650752  }
  0x93   : > { %v392_v11 = vmul.f32 %v1866_v4, %v391_v10  ;;  %v395_v12 = vstv %s1061_s19  ;;  %s1874_s27 = sld [smem:[#allocation10 + $0x1]]  ;;  %vm664_vm7 = vcmask 781952   ;;  %vm672_vm8 = vcmask 913152  }
  0x94   : > { %v389_v13 = vadd.f32 %v388_v9, %v385_v7  ;;  %v396_v14 = vmul.f32 %v1869_v6, %v395_v12  ;;  %s1077_s15 = sld [smem:[#allocation9 + $0x200]]  ;;  %v399_v22 = vstv %s1860_s14  ;;  %vm679_vm9 = vcmask 1044352  }
  0x95   : > { %v403_v15 = vstv %s1062_s12  ;;  %s1078_s8 = sld [smem:[#allocation9 + $0x201]] }
  0x96   : > { %v393_v16 = vadd.f32 %v392_v11, %v389_v13  ;;  %v404_v17 = vmul.f32 %v403_v15, %v1858_v2  ;;  %v406_v18 = vstv %s1063_s16  ;;  %s1079_s18 = sld [smem:[#allocation9 + $0x202]] }
  0x97   : > { %v407_v19 = vmul.f32 %v1863_v3, %v406_v18  ;;  %v410_v20 = vstv %s1064_s5  ;;  %s1080_s20 = sld [smem:[#allocation9 + $0x203]] }
  0x98   : > { %v397_v21 = vadd.f32 %v396_v14, %v393_v16  ;;  %v411_v23 = vmul.f32 %v1866_v4, %v410_v20  ;;  %v414_v24 = vstv %s1065_s13  ;;  %s1881_s10 = sld [smem:[#allocation10 + $0x4]] }
  0x99   : > { %v408_v25 = vadd.f32 %v407_v19, %v404_v17  ;;  %v415_v26 = vmul.f32 %v1869_v6, %v414_v24  ;;  %s1082_s21 = sld [smem:[#allocation9 + $0x280]]  ;;  %v418_v32 = vstv %s1874_s27 }
  0x9a   : > { %v460_v27 = vstv %s1077_s15  ;;  %s1083_s2 = sld [smem:[#allocation9 + $0x281]]  ;;  %v400_v28 = vadd.f32 %v399_v22, %v397_v21 }
  0x9b   : > { %v412_v29 = vadd.f32 %v411_v23, %v408_v25  ;;  %v461_v30 = vmul.f32 %v460_v27, %v1858_v2  ;;  %v463_v31 = vstv %s1078_s8  ;;  %s1084_s28 = sld [smem:[#allocation9 + $0x282]] }
  0x9c   : > { %v464_v33 = vmul.f32 %v1863_v3, %v463_v31  ;;  %v467_v34 = vstv %s1079_s18  ;;  %s1085_s19 = sld [smem:[#allocation9 + $0x283]]  ;;  %v401_v40 = vmax.f32 %v400_v28, 0.0 }
  0x9d   : > { %v416_v35 = vadd.f32 %v415_v26, %v412_v29  ;;  %v468_v36 = vmul.f32 %v1866_v4, %v467_v34  ;;  %v471_v37 = vstv %s1080_s20  ;;  %s1888_s14 = sld [smem:[#allocation10 + $0x5]] }
  0x9e   : > { %v465_v38 = vadd.f32 %v464_v33, %v461_v30  ;;  %v472_v39 = vmul.f32 %v1869_v6, %v471_v37  ;;  %s1067_s12 = sld [smem:[#allocation9 + $0x100]]  ;;  %v475_v50 = vstv %s1881_s10 }
  0x9f   : > { %v419_v41 = vadd.f32 %v418_v32, %v416_v35  ;;  %v479_v42 = vstv %s1082_s21  ;;  %s1068_s16 = sld [smem:[#allocation9 + $0x101]] }
  0xa0   : > { %v469_v43 = vadd.f32 %v468_v36, %v465_v38  ;;  %v480_v44 = vmul.f32 %v479_v42, %v1858_v2  ;;  %v482_v45 = vstv %s1083_s2  ;;  %s1069_s5 = sld [smem:[#allocation9 + $0x102]] }
  0xa1   : > { %v420_v46 = vmax.f32 %v419_v41, 0.0  ;;  %v483_v47 = vmul.f32 %v1863_v3, %v482_v45  ;;  %v486_v48 = vstv %s1084_s28  ;;  %s1070_s13 = sld [smem:[#allocation9 + $0x103]] }
  0xa2   : > { %v473_v49 = vadd.f32 %v472_v39, %v469_v43  ;;  %v487_v51 = vmul.f32 %v1866_v4, %v486_v48  ;;  %v490_v52 = vstv %s1085_s19  ;;  %s1895_s27 = sld [smem:[#allocation10 + $0x2]] }
  0xa3   : > { %v535_v53 = vpack.c.bf16 %v420_v46, %v401_v40  ;;  %v484_v54 = vadd.f32 %v483_v47, %v480_v44  ;;  %v491_v55 = vmul.f32 %v1869_v6, %v490_v52  ;;  %s1072_s15 = sld [smem:[#allocation9 + $0x180]]  ;;  %v494_v61 = vstv %s1888_s14 }
  0xa4   : > { %v422_v56 = vstv %s1067_s12  ;;  %s1073_s8 = sld [smem:[#allocation9 + $0x181]]  ;;  %v476_v57 = vadd.f32 %v475_v50, %v473_v49 }
  0xa5   : > { %1174 = vmatprep.mubr.msk.bf16.mxu0 %vm540_vm1, %v535_v53  ;;  %v488_v58 = vadd.f32 %v487_v51, %v484_v54  ;;  %v423_v59 = vmul.f32 %v422_v56, %v1858_v2  ;;  %v425_v60 = vstv %s1068_s16  ;;  %s1074_s18 = sld [smem:[#allocation9 + $0x182]] }
  0xa6   : > { %v426_v62 = vmul.f32 %v1863_v3, %v425_v60  ;;  %v429_v63 = vstv %s1069_s5  ;;  %s1075_s20 = sld [smem:[#allocation9 + $0x183]]  ;;  %v477_v9 = vmax.f32 %v476_v57, 0.0 }
  0xa7   : > { %v492_v0 = vadd.f32 %v491_v55, %v488_v58  ;;  %v430_v1 = vmul.f32 %v1866_v4, %v429_v63  ;;  %v433_v5 = vstv %s1070_s13  ;;  %s1903_s10 = sld [smem:[#allocation10 + $0x3]] }
  0xa8   : > { %v427_v7 = vadd.f32 %v426_v62, %v423_v59  ;;  %v434_v8 = vmul.f32 %v1869_v6, %v433_v5  ;;  %s1087_s21 = sld [smem:[#allocation9 + $0x300]]  ;;  %v437_v19 = vstv %s1895_s27 }
  0xa9   : > { %v495_v10 = vadd.f32 %v494_v61, %v492_v0  ;;  %v441_v11 = vstv %s1072_s15  ;;  %s1088_s2 = sld [smem:[#allocation9 + $0x301]]  ;;  %s1573_s15 = smov 32  }
  0xaa   : > { %v431_v12 = vadd.f32 %v430_v1, %v427_v7  ;;  %v442_v13 = vmul.f32 %v441_v11, %v1858_v2  ;;  %v444_v14 = vstv %s1073_s8  ;;  %s1089_s28 = sld [smem:[#allocation9 + $0x302]]  ;;  %s1574_s8 = smov 16  }
  0xab   : > { %v496_v15 = vmax.f32 %v495_v10, 0.0  ;;  %v445_v16 = vmul.f32 %v1863_v3, %v444_v14  ;;  %v448_v17 = vstv %s1074_s18  ;;  %s1090_s19 = sld [smem:[#allocation9 + $0x303]]  ;;  %s1575_s18 = smov 64  }
  0xac   : > { %v435_v18 = vadd.f32 %v434_v8, %v431_v12  ;;  %v449_v20 = vmul.f32 %v1866_v4, %v448_v17  ;;  %v452_v21 = vstv %s1075_s20  ;;  %s1910_s14 = sld [smem:[#allocation10 + $0x6]]  ;;  %s1576_s20 = smov 48  }
  0xad   : > { %v537_v22 = vpack.c.bf16 %v496_v15, %v477_v9  ;;  %v446_v23 = vadd.f32 %v445_v16, %v442_v13  ;;  %v453_v24 = vmul.f32 %v1869_v6, %v452_v21  ;;  %s1092_s12 = sld [smem:[#allocation9 + $0x380]]  ;;  %v456_v30 = vstv %s1903_s10  ;;  %s1577_s10 = smov 80  }
  0xae   : > { %v498_v25 = vstv %s1087_s21  ;;  %s1093_s16 = sld [smem:[#allocation9 + $0x381]]  ;;  %v438_v26 = vadd.f32 %v437_v19, %v435_v18  ;;  %s1578_s21 = smov 96  }
  0xaf   : > { %1178 = vmatprep.mubr.msk.bf16.mxu1 %vm540_vm1, %v537_v22  ;;  %v450_v27 = vadd.f32 %v449_v20, %v446_v23  ;;  %v499_v28 = vmul.f32 %v498_v25, %v1858_v2  ;;  %v501_v29 = vstv %s1088_s2  ;;  %s1094_s5 = sld [smem:[#allocation9 + $0x382]]  ;;  %s1579_s2 = smov 112  }
  0xb0   : > { %v502_v31 = vmul.f32 %v1863_v3, %v501_v29  ;;  %v505_v32 = vstv %s1089_s28  ;;  %s1095_s13 = sld [smem:[#allocation9 + $0x383]]  ;;  %v439_v38 = vmax.f32 %v438_v26, 0.0 }
  0xb1   : > { %v454_v33 = vadd.f32 %v453_v24, %v450_v27  ;;  %v506_v34 = vmul.f32 %v1866_v4, %v505_v32  ;;  %v509_v35 = vstv %s1090_s19  ;;  %s1096_s27 = sld [smem:[#allocation10 + $0x7]] }
  0xb2   : > { %v503_v36 = vadd.f32 %v502_v31, %v499_v28  ;;  %v510_v37 = vmul.f32 %v1869_v6, %v509_v35  ;;  %v513_v48 = vstv %s1910_s14 }
  0xb3   : > { %v457_v39 = vadd.f32 %v456_v30, %v454_v33  ;;  %v517_v40 = vstv %s1092_s12 }
  0xb4   : > { %v507_v41 = vadd.f32 %v506_v34, %v503_v36  ;;  %v518_v42 = vmul.f32 %v517_v40, %v1858_v2  ;;  %v520_v43 = vstv %s1093_s16 }
  0xb5   : > { %v458_v44 = vmax.f32 %v457_v39, 0.0  ;;  %v521_v45 = vmul.f32 %v1863_v3, %v520_v43  ;;  %v524_v46 = vstv %s1094_s5 }
  0xb6   : > { %v511_v47 = vadd.f32 %v510_v37, %v507_v41  ;;  %v525_v49 = vmul.f32 %v1866_v4, %v524_v46  ;;  %v528_v50 = vstv %s1095_s13 }
  0xb7   : > { %v536_v51 = vpack.c.bf16 %v458_v44, %v439_v38  ;;  %v522_v52 = vadd.f32 %v521_v45, %v518_v42  ;;  %v529_v53 = vmul.f32 %v1869_v6, %v528_v50  ;;  %v532_v56 = vstv %s1096_s27 }
  0xb8   : > { %v514_v54 = vadd.f32 %v513_v48, %v511_v47 }
  0xb9   : > { %1175 = vmatmul.mubr.msk.bf16.vlgmr.msra.gmra.mxu0 %vm540_vm1, %v536_v51  ;;  %v526_v55 = vadd.f32 %v525_v49, %v522_v52 }
  0xba   : > { %v515_v57 = vmax.f32 %v514_v54, 0.0 }
  0xbb   : > { %v530_v2 = vadd.f32 %v529_v53, %v526_v55 }
  0xbd   : > { %v533_v58 = vadd.f32 %v532_v56, %v530_v2 }
  0xbf   : > { %v534_v59 = vmax.f32 %v533_v58, 0.0 }
  0xc1   : > { %v538_v3 = vpack.c.bf16 %v534_v59, %v515_v57 }
  0xc3   : > { %1179 = vmatmul.mubr.msk.bf16.vlgmr.msra.gmra.mxu1 %vm540_vm1, %v538_v3 }
 0x179   : > { %v1176_v60 = vpop.f32.mrf.mxu0 }
 0x17a   : > { %v1159_v61 = vpack.c.bf16 %v1176_v60, %v1176_v60 }
 0x17b   : > { %v591_v4 = vpop.f32.mrf.mxu0 }
 0x17c   : > { %639 = vrot.lane.b32.xlu0 %v1159_v61, %s1573_s15 }
 0x17d   : > { %v1177_v62 = vpop.f32.mrf.mxu0 }
 0x17e   : > { %v1160_v10 = vpack.c.bf16 %v1177_v62, %v1177_v62 }
 0x17f   : > { %v594_v63 = vpop.f32.mrf.mxu0 }
 0x180   : > { %v622_v6 = vpack.c.bf16 %v594_v63, %v591_v4  ;;  %v1158_v0 = vpack.c.bf16 %v594_v63, %v594_v63 }
 0x182   : > { %627 = vst.msk [vmem:[#allocation2] sm:$0xf] %vm626_vm2, %v622_v6  ;;  %631 = vrot.lane.b32.xlu0 %v1158_v0, %s1574_s8 }
 0x183   : > { %v1180_v1 = vpop.f32.mrf.mxu1 }
 0x184   : > { %v1163_v12 = vpack.c.bf16 %v1180_v1, %v1180_v1 }
 0x185   : > { %v607_v5 = vpop.f32.mrf.mxu1 }
 0x186   : > { %v1161_v7 = vpack.c.bf16 %v607_v5, %v607_v5 }
 0x187   : > { %v1181_v8 = vpop.f32.mrf.mxu1 }
 0x188   : > { %654 = vrot.lane.b32.xlu1 %v1161_v7, %s1575_s18  ;;  %v1164_v13 = vpack.c.bf16 %v1181_v8, %v1181_v8 }
 0x189   : > { %v610_v9 = vpop.f32.mrf.mxu1 }
 0x18a   : > { %v1162_v11 = vpack.c.bf16 %v610_v9, %v610_v9 }
 0x18c   : > { %646 = vrot.lane.b32.xlu1 %v1160_v10, %s1576_s20  ;;  %661 = vrot.lane.b32.xlu0 %v1162_v11, %s1577_s10 }
 0x190   : > { %669 = vrot.lane.b32.xlu1 %v1163_v12, %s1578_s21  ;;  %676 = vrot.lane.b32.xlu0 %v1164_v13, %s1579_s2 }
 0x1ee   : > { %v640_v14 = vpop.permute.xlu0 %639 }
 0x1f4   : > { %v632_v15 = vpop.permute.xlu0 %631 }
 0x1f5   : > { %635 = vst.msk [vmem:[#allocation2] sm:$0xf] %vm634_vm3, %v632_v15 }
 0x1f6   : > { %643 = vst.msk [vmem:[#allocation2] sm:$0xf] %vm642_vm4, %v640_v14 }
 0x1fa   : > { %v655_v16 = vpop.permute.xlu1 %654 }
 0x1fe   : > { %v647_v17 = vpop.permute.xlu1 %646  ;;  %v662_v18 = vpop.permute.xlu0 %661 }
 0x1ff   : > { %650 = vst.msk [vmem:[#allocation2] sm:$0xf] %vm649_vm5, %v647_v17 }
 0x200   : > { %658 = vst.msk [vmem:[#allocation2] sm:$0xf] %vm657_vm6, %v655_v16 }
 0x201   : > { %665 = vst.msk [vmem:[#allocation2] sm:$0xf] %vm664_vm7, %v662_v18 }
 0x202   : > { %v670_v19 = vpop.permute.xlu1 %669  ;;  %v677_v20 = vpop.permute.xlu0 %676 }
 0x203   : > { %673 = vst.msk [vmem:[#allocation2] sm:$0xf] %vm672_vm8, %v670_v19 }
 0x204   : > { %680 = vst.msk [vmem:[#allocation2] sm:$0xf] %vm679_vm9, %v677_v20 }
 0x205 PF: > { %vm688_vm10 = vcmask 1043456   ;;  %v681_v22 = vld [vmem:[%s1849_s6] sm:$0xff]  ;;  %v1580_v23 = vmov 0.0   ;;  %vm1581_vm11 = vmmov 0   ;;  %vm684_vm12 = vcmask 64512   ;;  %s1582_s28 = smov 80  }
 0x206   : > { %1182 = vmatprep.subr.bf16.mxu0 %v1580_v23  ;;  %1184 = vmatprep.mubr.msk.bf16.mxu0 %vm1581_vm11, %v1580_v23  ;;  %v682_v25 = vpack.c.bf16 %v681_v22, %v681_v22  ;;  %vm732_vm13 = vcmask 130048   ;;  %s1583_s19 = smov 112   ;;  %s1584_s6 = smov 64   ;;  %v770_v30 = vld [vmem:[%s1823_s9] sm:$0xff]  ;;  %v1116_v31 = vld [vmem:[%s1823_s9 + $0x8] sm:$0xff]  ;;  %v1118_v33 = vld [vmem:[%s1823_s9 + $0x10] sm:$0xff] }
 0x207   : > { %s1585_s14 = smov 96   ;;  %s1586_s12 = smov 32   ;;  %v774_v32 = vmax.f32 %v770_v30, %v1116_v31  ;;  %v1120_v37 = vld [vmem:[%s1823_s9 + $0x18] sm:$0xff]  ;;  %v1122_v41 = vld [vmem:[%s1823_s9 + $0x20] sm:$0xff]  ;;  %v1124_v46 = vld [vmem:[%s1823_s9 + $0x28] sm:$0xff] }
 0x208   : > { %s1587_s16 = smov 48   ;;  %s1588_s5 = smov 16   ;;  %v1126_v54 = vld [vmem:[%s1823_s9 + $0x30] sm:$0xff]  ;;  %v1128_v59 = vld [vmem:[%s1823_s9 + $0x38] sm:$0xff] }
 0x209   : > { %v779_v36 = vmax.f32 %v774_v32, %v1118_v33  ;;  %s2101_s13 = sld [smem:[#allocation20_spill]]  ;;  %s891_s20 = sshll.u32 %s1851_s24, 4  ;;  %s1981_s20 = int_to_ptr.vmem [resolvable:$true] %s891_s20 }
 0x20a   : > { %s2102_s9 = sld [smem:[#allocation19_spill]] }
 0x20b   : > { %v683_v21 = vld [vmem:[#allocation2] sm:$0xf]  ;;  %v784_v40 = vmax.f32 %v779_v36, %v1120_v37  ;;  %s2103_s8 = sld [smem:[#allocation21_spill]] }
 0x20c   : > { %v690_v24 = vsel %vm688_vm10, %v683_v21, 0  ;;  %s2104_s2 = sld [smem:[#allocation28_spill]] }
 0x20d   : > { %1183 = vmatpush3.bf16.msra.mxu0 %v690_v24  ;;  %v789_v45 = vmax.f32 %v784_v40, %v1122_v41 }
 0x20f   : > { %v794_v51 = vmax.f32 %v789_v45, %v1124_v46  ;;  %s1153_s27 = sshll.u32 %s2101_s13, 4 }
 0x210   : > { %1185 = vmatmul.mubr.msk.bf16.vlgmr.msra.gmra.mxu0 %vm684_vm12, %v682_v25  ;;  %s888_s15 = sadd.s32 %s2102_s9, %s1153_s27 }
 0x211   : > { %v799_v2 = vmax.f32 %v794_v51, %v1126_v54  ;;  %s1154_s18 = sshll.u32 %s888_s15, 7  ;;  %p2105_p5 = scmp.ne.s32.totalorder %s2103_s8, 0 }
 0x213   : > { %v804_v61 = vmax.f32 %v799_v2, %v1128_v59 }
 0x2d0   : > { %v726_v26 = vpop.f32.mrf.mxu0 }
 0x2d1   : > { %733 = vst.msk [vmem:[%s1851_s24] sm:$0xff] %vm732_vm13, %v726_v26  ;;  %745 = vrot.lane.b32.xlu1 %v726_v26, %s1582_s28  ;;  %735 = vrot.lane.b32.xlu0 %v726_v26, %s1583_s19  ;;  %s1977_s28 = scalar_lea.hbm %s2104_s2, %s1154_s18  ;;  %s877_s19 = scalar_lea.sflag [#allocation5], %s1819_s11 }
 0x2d2   : > { %v1186_v27 = vpop.f32.mrf.mxu0 }
 0x2d4   : > { %v729_v28 = vpop.f32.mrf.mxu0 }
 0x2d5   : > { %750 = vrot.lane.b32.xlu1 %v726_v26, %s1584_s6  ;;  %740 = vrot.lane.b32.xlu0 %v726_v26, %s1585_s14  ;;  %s1432_s6 = scalar_lea.vmem %s1981_s20, 1024  ;;  %s1589_s14 = smov [#allocation12]  }
 0x2d6   : > { %v1187_v29 = vpop.f32.mrf.mxu0  ;;  %p1433_p10 = scmp.ne.s32.totalorder %s1981_s20, %s1432_s6 }
 0x2d8   : > { %v771_v47 = vld [vmem:[%s1851_s24] sm:$0xff]  ;;  %p1434_p6 = pnand %p1433_p10, %p2105_p5 }
 0x2d9   : > { %760 = vrot.lane.b32.xlu1 %v726_v26, %s1586_s12  ;;  %755 = vrot.lane.b32.xlu0 %v726_v26, %s1587_s16  ;;  %s1436_s12 = sshll.u32 %s1589_s14, 4  ;;  %s1437_s12 = int_to_ptr.vmem [resolvable:$false] %s1436_s12 }
 0x2da   : > { %p1435_p2 = pneg %p1434_p6  ;;  %s1438_s16 = scalar_lea.vmem %s1437_s12, 2048 }
 0x2db   : > { %p1439_p7 = scmp.lt.s32.totalorder %s1981_s20, %s1437_s12  ;;  %p1440_p11 = scmp.lt.s32.totalorder %s1438_s16, %s1432_s6 }
 0x2dd   : > { %765 = vrot.lane.b32.xlu0 %v726_v26, %s1588_s5  ;;  %p1441_p0 = por %p1440_p11, %p1439_p7 }
 0x2df   : > { %p1442_p4 = pnand %p1441_p0, %p1435_p2 }
 0x343   : > { %v746_v34 = vpop.permute.xlu1 %745  ;;  %v736_v35 = vpop.permute.xlu0 %735 }
 0x344   : > { %1111 = vst.msk [vmem:[%s1851_s24 + $0x18] sm:$0xff] %vm732_vm13, %v746_v34  ;;  %1109 = vst.msk [vmem:[%s1851_s24 + $0x8] sm:$0xff] %vm732_vm13, %v736_v35 }
 0x347   : > { %v751_v38 = vpop.permute.xlu1 %750  ;;  %v741_v39 = vpop.permute.xlu0 %740 }
 0x348   : > { %1112 = vst.msk [vmem:[%s1851_s24 + $0x20] sm:$0xff] %vm732_vm13, %v751_v38  ;;  %1110 = vst.msk [vmem:[%s1851_s24 + $0x10] sm:$0xff] %vm732_vm13, %v741_v39 }
 0x34b   : > { %v1132_v42 = vld [vmem:[%s1851_s24 + $0x8] sm:$0xff]  ;;  %v761_v43 = vpop.permute.xlu1 %760  ;;  %v756_v44 = vpop.permute.xlu0 %755  ;;  %v1138_v53 = vld [vmem:[%s1851_s24 + $0x18] sm:$0xff] }
 0x34c   : > { %1114 = vst.msk [vmem:[%s1851_s24 + $0x30] sm:$0xff] %vm732_vm13, %v761_v43  ;;  %1113 = vst.msk [vmem:[%s1851_s24 + $0x28] sm:$0xff] %vm732_vm13, %v756_v44  ;;  %v776_v48 = vmax.f32 %v771_v47, %v1132_v42 }
 0x34f   : > { %v1135_v49 = vld [vmem:[%s1851_s24 + $0x10] sm:$0xff]  ;;  %v766_v50 = vpop.permute.xlu0 %765  ;;  %v1141_v56 = vld [vmem:[%s1851_s24 + $0x20] sm:$0xff] }
 0x350   : > { %1115 = vst.msk [vmem:[%s1851_s24 + $0x38] sm:$0xff] %vm732_vm13, %v766_v50  ;;  %v781_v52 = vmax.f32 %v776_v48, %v1135_v49 }
 0x352   : > { %v786_v55 = vmax.f32 %v781_v52, %v1138_v53 }
 0x353   : > { %v1125_v58 = vld [vmem:[%s1851_s24 + $0x28] sm:$0xff]  ;;  %v1127_v60 = vld [vmem:[%s1851_s24 + $0x30] sm:$0xff] }
 0x354   : > { %v791_v57 = vmax.f32 %v786_v55, %v1141_v56 }
 0x356   : > { %v796_v3 = vmax.f32 %v791_v57, %v1125_v58 }
 0x357   : > { %v1129_v62 = vld [vmem:[%s1851_s24 + $0x38] sm:$0xff] }
 0x358   : > { %v801_v4 = vmax.f32 %v796_v3, %v1127_v60 }
 0x35a   : > { %v806_v63 = vmax.f32 %v801_v4, %v1129_v62 }
 0x35c   : > { %v807_v6 = vadd.f32 %v806_v63, %v804_v61 }
 0x35e   : > { %v1130_v0 = vmul.f32 -1.442695, %v807_v6 }
 0x360   : > { %1342 = vpow2.f32 %v1130_v0 }
 0x36d   : > { %v1343_v1 = vpop.eup %1342 }
 0x36e   : > { %v811_v5 = vadd.f32 1.0, %v1343_v1 }
 0x370   : > { %1344 = vrcp.f32 %v811_v5 }
 0x37d   : > { %v1345_v7 = vpop.eup %1344 }
 0x37e   : > { %v814_v8 = vmul.f32 %v1345_v7, %v770_v30  ;;  %v815_v9 = vmul.f32 %v1345_v7, %v771_v47  ;;  %v821_v10 = vmul.f32 %v1345_v7, %v1116_v31  ;;  %v823_v11 = vmul.f32 %v1345_v7, %v1132_v42 }
 0x37f   : > { %v829_v12 = vmul.f32 %v1345_v7, %v1118_v33  ;;  %v831_v13 = vmul.f32 %v1345_v7, %v1135_v49  ;;  %v837_v14 = vmul.f32 %v1345_v7, %v1120_v37  ;;  %v839_v15 = vmul.f32 %v1345_v7, %v1138_v53 }
 0x380   : > { %v816_v16 = vmul.f32 %v815_v9, %v814_v8  ;;  %v824_v17 = vmul.f32 %v823_v11, %v821_v10  ;;  %v845_v18 = vmul.f32 %v1345_v7, %v1122_v41  ;;  %v847_v19 = vmul.f32 %v1345_v7, %v1141_v56 }
 0x381   : > { %v832_v20 = vmul.f32 %v831_v13, %v829_v12  ;;  %v840_v21 = vmul.f32 %v839_v15, %v837_v14  ;;  %v853_v22 = vmul.f32 %v1345_v7, %v1124_v46  ;;  %v855_v23 = vmul.f32 %v1345_v7, %v1125_v58 }
 0x382   : > { %v817_v24 = vadd.f32 %v816_v16, %v814_v8  ;;  %v825_v25 = vadd.f32 %v824_v17, %v821_v10  ;;  %v848_v26 = vmul.f32 %v847_v19, %v845_v18  ;;  %v861_v27 = vmul.f32 %v1345_v7, %v1126_v54 }
 0x383   : > { %v833_v28 = vadd.f32 %v832_v20, %v829_v12  ;;  %v841_v29 = vadd.f32 %v840_v21, %v837_v14  ;;  %v856_v30 = vmul.f32 %v855_v23, %v853_v22  ;;  %v863_v31 = vmul.f32 %v1345_v7, %v1127_v60 }
 0x384   : > { %v818_v32 = vadd.f32 %v817_v24, %v815_v9  ;;  %v826_v33 = vadd.f32 %v825_v25, %v823_v11  ;;  %v849_v34 = vadd.f32 %v848_v26, %v845_v18  ;;  %v869_v35 = vmul.f32 %v1345_v7, %v1128_v59 }
 0x385   : > { %v834_v36 = vadd.f32 %v833_v28, %v831_v13  ;;  %v842_v37 = vadd.f32 %v841_v29, %v839_v15  ;;  %v857_v38 = vadd.f32 %v856_v30, %v853_v22  ;;  %v864_v39 = vmul.f32 %v863_v31, %v861_v27 }
 0x386   : > { %819 = vst.msk [vmem:[%s1851_s24] sm:$0xff] %vm732_vm13, %v818_v32  ;;  %1133 = vst.msk [vmem:[%s1851_s24 + $0x8] sm:$0xff] %vm732_vm13, %v826_v33  ;;  %v850_v40 = vadd.f32 %v849_v34, %v847_v19  ;;  %v871_v41 = vmul.f32 %v1345_v7, %v1129_v62 }
 0x387   : > { %1136 = vst.msk [vmem:[%s1851_s24 + $0x10] sm:$0xff] %vm732_vm13, %v834_v36  ;;  %1139 = vst.msk [vmem:[%s1851_s24 + $0x18] sm:$0xff] %vm732_vm13, %v842_v37  ;;  %v858_v42 = vadd.f32 %v857_v38, %v855_v23  ;;  %v865_v43 = vadd.f32 %v864_v39, %v861_v27 }
 0x388   : > { %1142 = vst.msk [vmem:[%s1851_s24 + $0x20] sm:$0xff] %vm732_vm13, %v850_v40  ;;  %v872_v44 = vmul.f32 %v871_v41, %v869_v35 }
 0x389   : > { %1145 = vst.msk [vmem:[%s1851_s24 + $0x28] sm:$0xff] %vm732_vm13, %v858_v42  ;;  %v866_v45 = vadd.f32 %v865_v43, %v863_v31 }
 0x38a   : > { %v873_v46 = vadd.f32 %v872_v44, %v869_v35 }
 0x38b   : > { %1148 = vst.msk [vmem:[%s1851_s24 + $0x30] sm:$0xff] %vm732_vm13, %v866_v45 }
 0x38c   : > { %v874_v47 = vadd.f32 %v873_v46, %v871_v41 }
 0x38e   : > { %1151 = vst.msk [vmem:[%s1851_s24 + $0x38] sm:$0xff] %vm732_vm13, %v874_v47 }
 0x38f   : > { %1445 = shalt.err (!%p1442_p4)
}
 0x390   : > { %s1446_s24 = scalar_lea.hbm %s1977_s28, 1024  ;;  %s1450_s9 = scalar_lea.hbm %s2104_s2, 4096 }
 0x391   : > { %p1447_p9 = scmp.ne.s32.totalorder %s1977_s28, %s1446_s24  ;;  %p1451_p1 = scmp.lt.s32.totalorder %s1977_s28, %s2104_s2 }
 0x392   : > { %p1452_p8 = scmp.lt.s32.totalorder %s1450_s9, %s1446_s24 }
 0x393   : > { %p1448_p13 = pnand %p1447_p9, %p2105_p5 }
 0x394   : > { %p1453_p12 = por %p1452_p8, %p1451_p1 }
 0x395   : > { %p1449_p3 = pneg %p1448_p13 }
 0x397   : > { %p1454_p10 = pnand %p1453_p12, %p1449_p3 }
 0x399   : > { %1457 = shalt.err (!%p1454_p10)
}
 0x39a   : > { %s1590_s18 = smov 128   ;;  %s1591_s10 = smov 256  }
 0x39b   : > { %s1592_s21 = smov 8  }
 0x39c   : > { %1204 = dma.vmem_to_hbm [thread:$0]  (%p2105_p5), %s1981_s20, 1024, %s1977_s28, %s877_s19, %s1590_s18, %s1591_s10, %s1592_s21  }
 0x39d PF: > { %s2106_s6 = sld [smem:[#allocation18_spill]]  ;;  %p1229_p6 = scmp.ge.s32.totalorder %s1564_s7, 2 }
 0x39e   : > { %s2107_s14 = sld [smem:[#allocation22_spill]] }
 0x3a3   : > { %s906_s12 = sand.u32 1, %s2106_s6  }
 0x3a4   : > { %p2108_p2 = scmp.ne.s32.totalorder %s2107_s14, 0  ;;  %s907_s16 = scalar_lea.sflag [#allocation5], %s906_s12 }
 0x3a6   : > { %p1221_p7 = pnand %p1229_p6, %p2108_p2 }
 0x3a8   : > { %p1222_p11 = pneg %p1221_p7 }
 0x3aa   : > { %1519 = dma.done.wait (%p1222_p11), %s907_s16, 1024  }
 0x3ab   : > { %1521 = vsyncadd (%p1222_p11), %s907_s16, 4294966272  ;;  %s27_s7 = sadd.s32 1, %s1564_s7   ;;  %s2109_s11 = sld [smem:[#allocation23_spill]] }
 0x3ac   : > { %p24_p0 = scmp.ge.s32.totalorder %s27_s7, 6   ;;  %s2110_s21 = smov %s1528_s22 }
 0x3ad   : > { %s2111_s22 = smov %s1532_s23  ;;  %s2112_s23 = smov %s1797_s3 }
 0x3ae   : > { %s2113_s24 = smov %s1540_s25  ;;  %s2114_s25 = smov %s1544_s26 }
 0x3af   : > { %s2115_s26 = smov %s1777_s4  ;;  %s2116_s27 = smov %s1556_s29 }
 0x3b0   : > { %s2117_s28 = smov %s1560_s30  ;;  %s2119_s30 = smov %s2125_s17 }
 0x3b1   : > { %s2118_s29 = smov %s2109_s11  ;;  %26 = sbr.rel (!%p24_p0) target bundleno = 19 (0x13), region = 135 }
 0x3b6   :  { %912 = vsyncpa [#allocation4], 1 }
 0x3b7   :  { %914 = vsyncpa [#allocation4 + $0x1], 1 }
 0x3b8   :  { %915 = vsyncpa [#allocation8], 1 }
 0x3b9   :  { %917 = vsyncpa [#allocation8 + $0x1], 1 }
 0x3ba   :  { %918 = vsyncpa [#allocation5], 1 }
 0x3bb   :  { %920 = vsyncpa [#allocation5 + $0x1], 1 }
 0x3bc   :  { %921 = vsyncpa [#allocation6], 1 }
 0x3bd   :  { %923 = vsyncpa [#allocation6 + $0x1], 1 }
 0x3be   :  { %924 = vsyncpa [#allocation11], 1 }

</bundles_post_ra>
